<compile_context>
chip_gen: v5e
topology: v5e:2x2
jax: 0.10.0
libtpu: 0.0.40
codegen_flags: <defaults>
</compile_context>

<pallas_src>
import functools

import jax
import jax.numpy as jnp
from jax.experimental import pallas as pl
from jax.experimental.pallas import tpu as pltpu

LATENT_DIM = 128
_COMPUTE_DTYPE = jnp.bfloat16        # MXU input dtype (accumulation is always f32)
_VMEM_LIMIT = 32 * 1024 * 1024       # safe on v5e / v6e / v7x


def _round_up(x, m):
    return (x + m - 1) // m * m


def _choose_tile_m(m):
    """Row tile: large tiles for MXU/pipeline efficiency; >=2 blocks when M is big enough
    so the 'parallel' axis can shard across both TensorCores on v7x."""
    if m >= 1024:
        return 512
    if m >= 256:
        return _round_up(-(-m // 2), 8)      # two blocks of >=128 rows
    return max(8, _round_up(m, 8))           # tiny problem: single block


# --------------------------------------------------------------------------------------
# Pallas kernels
# --------------------------------------------------------------------------------------
def _matmul_bias_kernel(x_ref, w_ref, b_ref, o_ref, *, relu):
    """o = relu?(x @ w + b); bf16 MXU inputs, f32 accumulate + epilogue."""
    acc = jnp.dot(x_ref[...], w_ref[...], preferred_element_type=jnp.float32)
    acc = acc + b_ref[...]                    # (1, N) broadcast over rows, f32
    if relu:
        acc = jnp.maximum(acc, 0.0)
    o_ref[...] = acc.astype(o_ref.dtype)


def _matmul_bias_head_kernel(x_ref, w_ref, b_ref, wh_ref, bh_ref, o_ref):
    """Fused conv2 + (mu|logvar) heads:
         h = x @ w + b            (no ReLU, f32)
         o = h @ w_head + b_head  (second MXU matmul, N=256 = mu(128) ++ logvar(128))."""
    h = jnp.dot(x_ref[...], w_ref[...], preferred_element_type=jnp.float32)
    h = h + b_ref[...]
    out = jnp.dot(h.astype(wh_ref.dtype), wh_ref[...],
                  preferred_element_type=jnp.float32)
    out = out + bh_ref[...]
    o_ref[...] = out.astype(o_ref.dtype)


# --------------------------------------------------------------------------------------
# pallas_call wrappers
# --------------------------------------------------------------------------------------
def matmul_bias(x, w, b, *, relu=False, out_dtype=jnp.float32):
    """x: (M, K), w: (K, N), b: (N,) -> (M, N) in out_dtype."""
    M, K = x.shape
    _, N = w.shape
    TM = _choose_tile_m(M)
    Mp = _round_up(M, TM)

    x = x.astype(_COMPUTE_DTYPE)
    if Mp != M:
        x = jnp.pad(x, ((0, Mp - M), (0, 0)))
    w = w.astype(_COMPUTE_DTYPE)
    b2 = b.reshape(1, N).astype(jnp.float32)

    out_bytes = jnp.dtype(out_dtype).itemsize
    cost = pl.CostEstimate(
        flops=2 * Mp * N * K,
        transcendentals=0,
        bytes_accessed=Mp * K * 2 + K * N * 2 + N * 4 + Mp * N * out_bytes,
    )
    out = pl.pallas_call(
        functools.partial(_matmul_bias_kernel, relu=relu),
        out_shape=jax.ShapeDtypeStruct((Mp, N), out_dtype),
        grid=(Mp // TM,),
        in_specs=[
            pl.BlockSpec((TM, K), lambda i: (i, 0)),
            pl.BlockSpec((K, N), lambda i: (0, 0)),    # grid-invariant -> stays resident
            pl.BlockSpec((1, N), lambda i: (0, 0)),    # grid-invariant -> stays resident
        ],
        out_specs=pl.BlockSpec((TM, N), lambda i: (i, 0)),
        compiler_params=pltpu.CompilerParams(
            dimension_semantics=("parallel",),
            vmem_limit_bytes=_VMEM_LIMIT,
        ),
        cost_estimate=cost,
    )(x, w, b2)
    return out[:M] if Mp != M else out


def matmul_bias_head(x, w, b, w_head, b_head):
    """Fused: (x @ w + b) @ w_head + b_head.  x: (M, K), w: (K, C), w_head: (C, Nh)."""
    M, K = x.shape
    _, C = w.shape
    _, Nh = w_head.shape
    TM = _choose_tile_m(M)
    Mp = _round_up(M, TM)

    x = x.astype(_COMPUTE_DTYPE)
    if Mp != M:
        x = jnp.pad(x, ((0, Mp - M), (0, 0)))

    cost = pl.CostEstimate(
        flops=2 * Mp * C * K + 2 * Mp * Nh * C,
        transcendentals=0,
        bytes_accessed=Mp * K * 2 + K * C * 2 + C * Nh * 2 + (C + Nh) * 4 + Mp * Nh * 4,
    )
    out = pl.pallas_call(
        _matmul_bias_head_kernel,
        out_shape=jax.ShapeDtypeStruct((Mp, Nh), jnp.float32),
        grid=(Mp // TM,),
        in_specs=[
            pl.BlockSpec((TM, K), lambda i: (i, 0)),
            pl.BlockSpec((K, C), lambda i: (0, 0)),
            pl.BlockSpec((1, C), lambda i: (0, 0)),
            pl.BlockSpec((C, Nh), lambda i: (0, 0)),
            pl.BlockSpec((1, Nh), lambda i: (0, 0)),
        ],
        out_specs=pl.BlockSpec((TM, Nh), lambda i: (i, 0)),
        compiler_params=pltpu.CompilerParams(
            dimension_semantics=("parallel",),
            vmem_limit_bytes=_VMEM_LIMIT,
        ),
        cost_estimate=cost,
    )(
        x,
        w.astype(_COMPUTE_DTYPE),
        b.reshape(1, C).astype(jnp.float32),
        w_head.astype(_COMPUTE_DTYPE),
        b_head.reshape(1, Nh).astype(jnp.float32),
    )
    return out[:M] if Mp != M else out


# --------------------------------------------------------------------------------------
# im2col patch extraction (plain JAX, bf16) + conv wrappers
# --------------------------------------------------------------------------------------
def im2col(x_nhwc, kh, kw, stride, pad):
    N, H, W, C = x_nhwc.shape
    xp = jnp.pad(x_nhwc, ((0, 0), (pad, pad), (pad, pad), (0, 0)))
    Ho = (H + 2 * pad - kh) // stride + 1
    Wo = (W + 2 * pad - kw) // stride + 1
    patches = []
    for i in range(kh):
        for j in range(kw):
            patches.append(xp[:, i:i + Ho * stride:stride, j:j + Wo * stride:stride, :])
    cols = jnp.concatenate(patches, axis=-1)        # K ordered (ki, kj, c)
    return cols.reshape(N * Ho * Wo, kh * kw * C), N, Ho, Wo


def _weight_to_2d(w_oikk):
    """PyTorch (C_out, C_in, kh, kw) -> (kh*kw*C_in, C_out), matching im2col K ordering."""
    c_out, c_in, kh, kw = w_oikk.shape
    return jnp.transpose(w_oikk, (2, 3, 1, 0)).reshape(kh * kw * c_in, c_out)


def conv2d(x_nhwc, w_oikk, b, *, stride, pad, relu=False, out_dtype=jnp.float32):
    c_out, c_in, kh, kw = w_oikk.shape
    cols, N, Ho, Wo = im2col(x_nhwc, kh, kw, stride, pad)
    y = matmul_bias(cols, _weight_to_2d(w_oikk), b, relu=relu, out_dtype=out_dtype)
    return y.reshape(N, Ho, Wo, c_out)


def conv2d_fused_heads(x_nhwc, w_oikk, b, w_mu, b_mu, w_lv, b_lv, *, stride, pad):
    """conv2 (3x3, no ReLU) fused with the two 1x1 heads (concatenated -> N=256)."""
    c_out, c_in, kh, kw = w_oikk.shape
    cols, N, Ho, Wo = im2col(x_nhwc, kh, kw, stride, pad)
    # 1x1 head weights: (C_out, C_in, 1, 1) -> (C_in, C_out); concat along out channels.
    wh = jnp.concatenate([w_mu[:, :, 0, 0].T, w_lv[:, :, 0, 0].T], axis=1)   # (128, 256)
    bh = jnp.concatenate([b_mu, b_lv], axis=0)                               # (256,)
    y = matmul_bias_head(cols, _weight_to_2d(w_oikk), b, wh, bh)             # (M, 256) f32
    y = y.reshape(N, Ho, Wo, 2 * LATENT_DIM)
    return y[..., :LATENT_DIM], y[..., LATENT_DIM:]


# --------------------------------------------------------------------------------------
# Parameters (deterministic, shapes as in the PyTorch Encoder.__init__)
# --------------------------------------------------------------------------------------
def init_params(key):
    def conv_param(k, c_out, c_in, kh, kw):
        kw_, kb_ = jax.random.split(k)
        fan_in = c_in * kh * kw
        scale = 1.0 / jnp.sqrt(jnp.float32(fan_in))
        w = jax.random.uniform(kw_, (c_out, c_in, kh, kw), jnp.float32, -scale, scale)
        b = jax.random.uniform(kb_, (c_out,), jnp.float32, -scale, scale)
        return w, b

    ks = jax.random.split(key, 5)
    return {
        "conv0": conv_param(ks[0], 64, 3, 4, 4),                    # Conv2d(3, 64, 4, 2, 1)
        "conv1": conv_param(ks[1], 128, 64, 4, 4),                  # Conv2d(64, 128, 4, 2, 1)
        "conv2": conv_param(ks[2], LATENT_DIM, 128, 3, 3),          # Conv2d(128, 128, 3, 1, 1)
        "mu": conv_param(ks[3], LATENT_DIM, LATENT_DIM, 1, 1),      # 1x1
        "logvar": conv_param(ks[4], LATENT_DIM, LATENT_DIM, 1, 1),  # 1x1
    }


def encoder_forward(params, x_nchw):
    x = jnp.transpose(x_nchw, (0, 2, 3, 1)).astype(_COMPUTE_DTYPE)   # NCHW -> NHWC (bf16)

    w, b = params["conv0"]
    x = conv2d(x, w, b, stride=2, pad=1, relu=True, out_dtype=_COMPUTE_DTYPE)   # (N,H/2,W/2,64)
    w, b = params["conv1"]
    x = conv2d(x, w, b, stride=2, pad=1, relu=True, out_dtype=_COMPUTE_DTYPE)   # (N,H/4,W/4,128)

    w2, b2 = params["conv2"]
    w_mu, b_mu = params["mu"]
    w_lv, b_lv = params["logvar"]
    mu, logvar = conv2d_fused_heads(x, w2, b2, w_mu, b_mu, w_lv, b_lv, stride=1, pad=1)

    # back to PyTorch NCHW, f32
    mu = jnp.transpose(mu, (0, 3, 1, 2))
    logvar = jnp.transpose(logvar, (0, 3, 1, 2))
    return mu, logvar


if __name__ == "__main__":
    key = jax.random.PRNGKey(0)
    k_param, k_x = jax.random.split(key)
    params = init_params(k_param)

    x = jax.random.normal(k_x, (2, 3, 16, 16), dtype=jnp.float32)    # NCHW like PyTorch

    mu, logvar = jax.jit(encoder_forward)(params, x)
    mu = jax.block_until_ready(mu)
    logvar = jax.block_until_ready(logvar)

    assert mu.shape == (2, LATENT_DIM, 4, 4), mu.shape
    assert logvar.shape == (2, LATENT_DIM, 4, 4), logvar.shape
    assert mu.dtype == jnp.float32 and logvar.dtype == jnp.float32
    assert bool(jnp.isfinite(mu).all()) and bool(jnp.isfinite(logvar).all())

    print("KERNEL_OK")
</pallas_src>

<mosaic_0001>
module attributes {stable_mosaic.version = 11 : i64} {
  func.func @_matmul_bias_kernel(%arg0: i32, %arg1: memref<128x48xbf16, #tpu.memory_space<vmem>>, %arg2: memref<48x64xbf16, #tpu.memory_space<vmem>>, %arg3: memref<1x64xf32, #tpu.memory_space<vmem>>, %arg4: memref<128x64xbf16, #tpu.memory_space<vmem>>) attributes {dimension_semantics = [#tpu.dimension_semantics<parallel>], iteration_bounds = array<i64: 1>, scalar_prefetch = 0 : i64, scratch_operands = 0 : i64, tpu.core_type = #tpu.core_type<tc>, window_params = [{transform_indices = @transform_0, window_bounds = array<i64: 128, 48>}, {pipeline_mode = #tpu.pipeline_mode<synchronous>, transform_indices = @transform_1, window_bounds = array<i64: 48, 64>}, {pipeline_mode = #tpu.pipeline_mode<synchronous>, transform_indices = @transform_2, window_bounds = array<i64: 1, 64>}, {transform_indices = @transform_3, window_bounds = array<i64: 128, 64>}]} {
    %c0 = arith.constant 0 : index
    %c0_0 = arith.constant 0 : index
    %0 = vector.load %arg1[%c0, %c0_0] : memref<128x48xbf16, #tpu.memory_space<vmem>>, vector<128x48xbf16>
    %c0_1 = arith.constant 0 : index
    %c0_2 = arith.constant 0 : index
    %1 = vector.load %arg2[%c0_1, %c0_2] : memref<48x64xbf16, #tpu.memory_space<vmem>>, vector<48x64xbf16>
    %cst = arith.constant dense<0.000000e+00> : vector<128x64xf32>
    %2 = tpu.matmul %0, %1, %cst {dimension_numbers = #tpu.dot_dimension_numbers<[1], [0], [0], [1], [0, 0, 1, 1], [], []>} : vector<128x48xbf16>, vector<48x64xbf16>, vector<128x64xf32> -> vector<128x64xf32>
    %c0_3 = arith.constant 0 : index
    %c0_4 = arith.constant 0 : index
    %3 = vector.load %arg3[%c0_3, %c0_4] : memref<1x64xf32, #tpu.memory_space<vmem>>, vector<1x64xf32>
    %4 = vector.broadcast %3 : vector<1x64xf32> to vector<128x64xf32>
    %5 = arith.addf %2, %4 : vector<128x64xf32>
    %cst_5 = arith.constant 0.000000e+00 : f32
    %6 = vector.broadcast %cst_5 : f32 to vector<128x64xf32>
    %7 = arith.maximumf %5, %6 : vector<128x64xf32>
    %8 = arith.truncf %7 : vector<128x64xf32> to vector<128x64xbf16>
    %c0_6 = arith.constant 0 : index
    %c0_7 = arith.constant 0 : index
    %9 = vector.load %arg4[%c0_6, %c0_7] : memref<128x64xbf16, #tpu.memory_space<vmem>>, vector<128x64xbf16>
    tpu.vector_store %arg4[%c0_6, %c0_7], %8 {strides = array<i32>} : memref<128x64xbf16, #tpu.memory_space<vmem>>, vector<128x64xbf16>,
    return
  }
  func.func @transform_0(%arg0: i32) -> (i32, i32) {
    %c0_i32 = arith.constant 0 : i32
    %c0_i32_0 = arith.constant 0 : i32
    return %arg0, %c0_i32 : i32, i32
  }
  func.func @transform_1(%arg0: i32) -> (i32, i32) {
    %c0_i32 = arith.constant 0 : i32
    %c0_i32_0 = arith.constant 0 : i32
    %c0_i32_1 = arith.constant 0 : i32
    return %c0_i32, %c0_i32_0 : i32, i32
  }
  func.func @transform_2(%arg0: i32) -> (i32, i32) {
    %c0_i32 = arith.constant 0 : i32
    %c0_i32_0 = arith.constant 0 : i32
    %c0_i32_1 = arith.constant 0 : i32
    return %c0_i32, %c0_i32_0 : i32, i32
  }
  func.func @transform_3(%arg0: i32) -> (i32, i32) {
    %c0_i32 = arith.constant 0 : i32
    %c0_i32_0 = arith.constant 0 : i32
    return %arg0, %c0_i32 : i32, i32
  }
}

module attributes {stable_mosaic.version = 11 : i64} {
  func.func @_matmul_bias_kernel(%arg0: i32, %arg1: memref<32x1024xbf16, #tpu.memory_space<vmem>>, %arg2: memref<1024x128xbf16, #tpu.memory_space<vmem>>, %arg3: memref<1x128xf32, #tpu.memory_space<vmem>>, %arg4: memref<32x128xbf16, #tpu.memory_space<vmem>>) attributes {dimension_semantics = [#tpu.dimension_semantics<parallel>], iteration_bounds = array<i64: 1>, scalar_prefetch = 0 : i64, scratch_operands = 0 : i64, tpu.core_type = #tpu.core_type<tc>, window_params = [{transform_indices = @transform_0, window_bounds = array<i64: 32, 1024>}, {pipeline_mode = #tpu.pipeline_mode<synchronous>, transform_indices = @transform_1, window_bounds = array<i64: 1024, 128>}, {pipeline_mode = #tpu.pipeline_mode<synchronous>, transform_indices = @transform_2, window_bounds = array<i64: 1, 128>}, {transform_indices = @transform_3, window_bounds = array<i64: 32, 128>}]} {
    %c0 = arith.constant 0 : index
    %c0_0 = arith.constant 0 : index
    %0 = vector.load %arg1[%c0, %c0_0] : memref<32x1024xbf16, #tpu.memory_space<vmem>>, vector<32x1024xbf16>
    %c0_1 = arith.constant 0 : index
    %c0_2 = arith.constant 0 : index
    %1 = vector.load %arg2[%c0_1, %c0_2] : memref<1024x128xbf16, #tpu.memory_space<vmem>>, vector<1024x128xbf16>
    %cst = arith.constant dense<0.000000e+00> : vector<32x128xf32>
    %2 = tpu.matmul %0, %1, %cst {dimension_numbers = #tpu.dot_dimension_numbers<[1], [0], [0], [1], [0, 0, 1, 1], [], []>} : vector<32x1024xbf16>, vector<1024x128xbf16>, vector<32x128xf32> -> vector<32x128xf32>
    %c0_3 = arith.constant 0 : index
    %c0_4 = arith.constant 0 : index
    %3 = vector.load %arg3[%c0_3, %c0_4] : memref<1x128xf32, #tpu.memory_space<vmem>>, vector<1x128xf32>
    %4 = vector.broadcast %3 : vector<1x128xf32> to vector<32x128xf32>
    %5 = arith.addf %2, %4 : vector<32x128xf32>
    %cst_5 = arith.constant 0.000000e+00 : f32
    %6 = vector.broadcast %cst_5 : f32 to vector<32x128xf32>
    %7 = arith.maximumf %5, %6 : vector<32x128xf32>
    %8 = arith.truncf %7 : vector<32x128xf32> to vector<32x128xbf16>
    %c0_6 = arith.constant 0 : index
    %c0_7 = arith.constant 0 : index
    %9 = vector.load %arg4[%c0_6, %c0_7] : memref<32x128xbf16, #tpu.memory_space<vmem>>, vector<32x128xbf16>
    tpu.vector_store %arg4[%c0_6, %c0_7], %8 {strides = array<i32>} : memref<32x128xbf16, #tpu.memory_space<vmem>>, vector<32x128xbf16>,
    return
  }
  func.func @transform_0(%arg0: i32) -> (i32, i32) {
    %c0_i32 = arith.constant 0 : i32
    %c0_i32_0 = arith.constant 0 : i32
    return %arg0, %c0_i32 : i32, i32
  }
  func.func @transform_1(%arg0: i32) -> (i32, i32) {
    %c0_i32 = arith.constant 0 : i32
    %c0_i32_0 = arith.constant 0 : i32
    %c0_i32_1 = arith.constant 0 : i32
    return %c0_i32, %c0_i32_0 : i32, i32
  }
  func.func @transform_2(%arg0: i32) -> (i32, i32) {
    %c0_i32 = arith.constant 0 : i32
    %c0_i32_0 = arith.constant 0 : i32
    %c0_i32_1 = arith.constant 0 : i32
    return %c0_i32, %c0_i32_0 : i32, i32
  }
  func.func @transform_3(%arg0: i32) -> (i32, i32) {
    %c0_i32 = arith.constant 0 : i32
    %c0_i32_0 = arith.constant 0 : i32
    return %arg0, %c0_i32 : i32, i32
  }
}

module attributes {stable_mosaic.version = 11 : i64} {
  func.func @_matmul_bias_head_kernel(%arg0: i32, %arg1: memref<32x1152xbf16, #tpu.memory_space<vmem>>, %arg2: memref<1152x128xbf16, #tpu.memory_space<vmem>>, %arg3: memref<1x128xf32, #tpu.memory_space<vmem>>, %arg4: memref<128x256xbf16, #tpu.memory_space<vmem>>, %arg5: memref<1x256xf32, #tpu.memory_space<vmem>>, %arg6: memref<32x256xf32, #tpu.memory_space<vmem>>) attributes {dimension_semantics = [#tpu.dimension_semantics<parallel>], iteration_bounds = array<i64: 1>, scalar_prefetch = 0 : i64, scratch_operands = 0 : i64, tpu.core_type = #tpu.core_type<tc>, window_params = [{transform_indices = @transform_0, window_bounds = array<i64: 32, 1152>}, {pipeline_mode = #tpu.pipeline_mode<synchronous>, transform_indices = @transform_1, window_bounds = array<i64: 1152, 128>}, {pipeline_mode = #tpu.pipeline_mode<synchronous>, transform_indices = @transform_2, window_bounds = array<i64: 1, 128>}, {pipeline_mode = #tpu.pipeline_mode<synchronous>, transform_indices = @transform_3, window_bounds = array<i64: 128, 256>}, {pipeline_mode = #tpu.pipeline_mode<synchronous>, transform_indices = @transform_4, window_bounds = array<i64: 1, 256>}, {transform_indices = @transform_5, window_bounds = array<i64: 32, 256>}]} {
    %c0 = arith.constant 0 : index
    %c0_0 = arith.constant 0 : index
    %0 = vector.load %arg1[%c0, %c0_0] : memref<32x1152xbf16, #tpu.memory_space<vmem>>, vector<32x1152xbf16>
    %c0_1 = arith.constant 0 : index
    %c0_2 = arith.constant 0 : index
    %1 = vector.load %arg2[%c0_1, %c0_2] : memref<1152x128xbf16, #tpu.memory_space<vmem>>, vector<1152x128xbf16>
    %cst = arith.constant dense<0.000000e+00> : vector<32x128xf32>
    %2 = tpu.matmul %0, %1, %cst {dimension_numbers = #tpu.dot_dimension_numbers<[1], [0], [0], [1], [0, 0, 1, 1], [], []>} : vector<32x1152xbf16>, vector<1152x128xbf16>, vector<32x128xf32> -> vector<32x128xf32>
    %c0_3 = arith.constant 0 : index
    %c0_4 = arith.constant 0 : index
    %3 = vector.load %arg3[%c0_3, %c0_4] : memref<1x128xf32, #tpu.memory_space<vmem>>, vector<1x128xf32>
    %4 = vector.broadcast %3 : vector<1x128xf32> to vector<32x128xf32>
    %5 = arith.addf %2, %4 : vector<32x128xf32>
    %6 = arith.truncf %5 : vector<32x128xf32> to vector<32x128xbf16>
    %c0_5 = arith.constant 0 : index
    %c0_6 = arith.constant 0 : index
    %7 = vector.load %arg4[%c0_5, %c0_6] : memref<128x256xbf16, #tpu.memory_space<vmem>>, vector<128x256xbf16>
    %cst_7 = arith.constant dense<0.000000e+00> : vector<32x256xf32>
    %8 = tpu.matmul %6, %7, %cst_7 {dimension_numbers = #tpu.dot_dimension_numbers<[1], [0], [0], [1], [0, 0, 1, 1], [], []>} : vector<32x128xbf16>, vector<128x256xbf16>, vector<32x256xf32> -> vector<32x256xf32>
    %c0_8 = arith.constant 0 : index
    %c0_9 = arith.constant 0 : index
    %9 = vector.load %arg5[%c0_8, %c0_9] : memref<1x256xf32, #tpu.memory_space<vmem>>, vector<1x256xf32>
    %10 = vector.broadcast %9 : vector<1x256xf32> to vector<32x256xf32>
    %11 = arith.addf %8, %10 : vector<32x256xf32>
    %c0_10 = arith.constant 0 : index
    %c0_11 = arith.constant 0 : index
    %12 = vector.load %arg6[%c0_10, %c0_11] : memref<32x256xf32, #tpu.memory_space<vmem>>, vector<32x256xf32>
    tpu.vector_store %arg6[%c0_10, %c0_11], %11 {strides = array<i32>} : memref<32x256xf32, #tpu.memory_space<vmem>>, vector<32x256xf32>,
    return
  }
  func.func @transform_0(%arg0: i32) -> (i32, i32) {
    %c0_i32 = arith.constant 0 : i32
    %c0_i32_0 = arith.constant 0 : i32
    return %arg0, %c0_i32 : i32, i32
  }
  func.func @transform_1(%arg0: i32) -> (i32, i32) {
    %c0_i32 = arith.constant 0 : i32
    %c0_i32_0 = arith.constant 0 : i32
    %c0_i32_1 = arith.constant 0 : i32
    return %c0_i32, %c0_i32_0 : i32, i32
  }
  func.func @transform_2(%arg0: i32) -> (i32, i32) {
    %c0_i32 = arith.constant 0 : i32
    %c0_i32_0 = arith.constant 0 : i32
    %c0_i32_1 = arith.constant 0 : i32
    return %c0_i32, %c0_i32_0 : i32, i32
  }
  func.func @transform_3(%arg0: i32) -> (i32, i32) {
    %c0_i32 = arith.constant 0 : i32
    %c0_i32_0 = arith.constant 0 : i32
    %c0_i32_1 = arith.constant 0 : i32
    return %c0_i32, %c0_i32_0 : i32, i32
  }
  func.func @transform_4(%arg0: i32) -> (i32, i32) {
    %c0_i32 = arith.constant 0 : i32
    %c0_i32_0 = arith.constant 0 : i32
    %c0_i32_1 = arith.constant 0 : i32
    return %c0_i32, %c0_i32_0 : i32, i32
  }
  func.func @transform_5(%arg0: i32) -> (i32, i32) {
    %c0_i32 = arith.constant 0 : i32
    %c0_i32_0 = arith.constant 0 : i32
    return %arg0, %c0_i32 : i32, i32
  }
}

</mosaic_0001>

<bundles_post_ra>
// kernel: encoder_forward.3
= control target key start
LH: loop header
LB: loop body
LE: loop exit
PB: predicated region body
PF: predicated region fallthrough
CT: control target
= control target key end

     0   :  { %vm99_vm0 = vcmask 392192   ;;  %vm205_vm1 = vcmask 519168   ;;  %s445_s1 = inlined_call_operand.vmem [shape: bf16[48,64], index: 1, kind: input, shape index: {}]   ;;  %s446_s2 = inlined_call_operand.vmem [shape: f32[1,64], index: 2, kind: input, shape index: {}]   ;;  %s447_s0 = inlined_call_operand.vmem [shape: bf16[128,48], index: 0, kind: input, shape index: {}]   ;;  %s448_s3 = inlined_call_operand.vmem [shape: bf16[128,64], index: 3, kind: output, shape index: {}]  }
   0x1   :  { %v288_v0 = vld [vmem:[%s445_s1 + $0x10] sm:$0xff]  ;;  %v287_v1 = vld [vmem:[%s445_s1 + $0x8] sm:$0xff]  ;;  %v286_v2 = vld [vmem:[%s445_s1] sm:$0xff] }
   0x2   :  { %129 = vmatpush.bf16.msra.mxu0 %v288_v0  ;;  %289 = vmatpush.bf16.msra.mxu1 %v288_v0  ;;  %v278_v3 = vld [vmem:[%s447_s0] sm:$0xff]  ;;  %v280_v4 = vld [vmem:[%s447_s0 + $0x10] sm:$0xff]  ;;  %v279_v7 = vld [vmem:[%s447_s0 + $0x8] sm:$0xff] }
   0x3   :  { %290 = vmatpush.bf16.msra.mxu2 %v288_v0  ;;  %291 = vmatpush.bf16.msra.mxu3 %v288_v0  ;;  %v282_v5 = vld [vmem:[%s447_s0 + $0x20] sm:$0xff]  ;;  %v284_v6 = vld [vmem:[%s447_s0 + $0x30] sm:$0xff]  ;;  %v281_v8 = vld [vmem:[%s447_s0 + $0x18] sm:$0xff] }
   0x4   :  { %v283_v9 = vld [vmem:[%s447_s0 + $0x28] sm:$0xff]  ;;  %v285_v10 = vld [vmem:[%s447_s0 + $0x38] sm:$0xff]  ;;  %v363_v11 = vld [vmem:[%s446_s2] ss:$0 sm:$0xff] }
   0x6   :  { %130 = vmatpush.bf16.msra.mxu0 %v287_v1  ;;  %292 = vmatpush.bf16.msra.mxu1 %v287_v1 }
   0x7   :  { %293 = vmatpush.bf16.msra.mxu2 %v287_v1  ;;  %294 = vmatpush.bf16.msra.mxu3 %v287_v1 }
   0xa   :  { %131 = vmatpush.bf16.msra.mxu0 %v286_v2  ;;  %295 = vmatpush.bf16.msra.mxu1 %v286_v2 }
   0xb   :  { %296 = vmatpush.bf16.msra.mxu2 %v286_v2  ;;  %297 = vmatpush.bf16.msra.mxu3 %v286_v2 }
   0xd   :  { %270 = vmatmul.msk.bf16.vlgmr.msra.gmra.mxu0 %vm99_vm0, %v278_v3  ;;  %272 = vmatmul.msk.bf16.vlgmr.msra.gmra.mxu1 %vm99_vm0, %v280_v4 }
   0xe   :  { %274 = vmatmul.msk.bf16.vlgmr.msra.gmra.mxu2 %vm99_vm0, %v282_v5  ;;  %276 = vmatmul.msk.bf16.vlgmr.msra.gmra.mxu3 %vm99_vm0, %v284_v6 }
  0x1d   :  { %271 = vmatmul.msk.bf16.gmra.mxu0 %vm99_vm0, %v279_v7  ;;  %273 = vmatmul.msk.bf16.gmra.mxu1 %vm99_vm0, %v281_v8 }
  0x1e   :  { %275 = vmatmul.msk.bf16.gmra.mxu2 %vm99_vm0, %v283_v9  ;;  %277 = vmatmul.msk.bf16.gmra.mxu3 %vm99_vm0, %v285_v10 }
  0x8a   :  { %v133_v12 = vpop.f32.mrf.mxu0  ;;  %v143_v13 = vpop.f32.mrf.mxu1 }
  0x8b   :  { %v134_v14 = vadd.f32 %v363_v11, %v133_v12  ;;  %v144_v15 = vadd.f32 %v363_v11, %v143_v13 }
  0x8d   :  { %v173_v16 = vmax.f32 %v134_v14, 0.0  ;;  %v177_v17 = vmax.f32 %v144_v15, 0.0 }
  0x8f   :  { %v189_v18 = vpack.c.bf16 %v173_v16, %v173_v16  ;;  %v193_v19 = vpack.c.bf16 %v177_v17, %v177_v17 }
  0x91   :  { %206 = vst.msk [vmem:[%s448_s3] sm:$0xf] %vm205_vm1, %v189_v18  ;;  %v153_v20 = vpop.f32.mrf.mxu2  ;;  %v163_v21 = vpop.f32.mrf.mxu3 }
  0x92   :  { %210 = vst.msk [vmem:[%s448_s3 + $0x10] sm:$0xf] %vm205_vm1, %v193_v19  ;;  %v154_v22 = vadd.f32 %v363_v11, %v153_v20  ;;  %v164_v23 = vadd.f32 %v363_v11, %v163_v21  ;;  %v135_v24 = vpop.f32.mrf.mxu0  ;;  %v145_v25 = vpop.f32.mrf.mxu1 }
  0x93   :  { %v136_v26 = vadd.f32 %v363_v11, %v135_v24  ;;  %v146_v27 = vadd.f32 %v363_v11, %v145_v25 }
  0x94   :  { %v181_v28 = vmax.f32 %v154_v22, 0.0  ;;  %v185_v29 = vmax.f32 %v164_v23, 0.0 }
  0x95   :  { %v174_v30 = vmax.f32 %v136_v26, 0.0  ;;  %v178_v31 = vmax.f32 %v146_v27, 0.0 }
  0x96   :  { %v197_v32 = vpack.c.bf16 %v181_v28, %v181_v28  ;;  %v201_v33 = vpack.c.bf16 %v185_v29, %v185_v29 }
  0x97   :  { %v190_v34 = vpack.c.bf16 %v174_v30, %v174_v30  ;;  %v194_v35 = vpack.c.bf16 %v178_v31, %v178_v31 }
  0x98   :  { %214 = vst.msk [vmem:[%s448_s3 + $0x20] sm:$0xf] %vm205_vm1, %v197_v32 }
  0x99   :  { %218 = vst.msk [vmem:[%s448_s3 + $0x30] sm:$0xf] %vm205_vm1, %v201_v33  ;;  %v155_v36 = vpop.f32.mrf.mxu2  ;;  %v165_v37 = vpop.f32.mrf.mxu3 }
  0x9a   :  { %207 = vst.msk [vmem:[%s448_s3 + $0x4] sm:$0xf] %vm205_vm1, %v190_v34  ;;  %v156_v38 = vadd.f32 %v363_v11, %v155_v36  ;;  %v166_v39 = vadd.f32 %v363_v11, %v165_v37  ;;  %v138_v40 = vpop.f32.mrf.mxu0  ;;  %v148_v41 = vpop.f32.mrf.mxu1 }
  0x9b   :  { %211 = vst.msk [vmem:[%s448_s3 + $0x14] sm:$0xf] %vm205_vm1, %v194_v35  ;;  %v139_v42 = vadd.f32 %v363_v11, %v138_v40  ;;  %v149_v43 = vadd.f32 %v363_v11, %v148_v41 }
  0x9c   :  { %v182_v44 = vmax.f32 %v156_v38, 0.0  ;;  %v186_v45 = vmax.f32 %v166_v39, 0.0 }
  0x9d   :  { %v175_v46 = vmax.f32 %v139_v42, 0.0  ;;  %v179_v47 = vmax.f32 %v149_v43, 0.0 }
  0x9e   :  { %v198_v48 = vpack.c.bf16 %v182_v44, %v182_v44  ;;  %v202_v49 = vpack.c.bf16 %v186_v45, %v186_v45 }
  0x9f   :  { %v191_v50 = vpack.c.bf16 %v175_v46, %v175_v46  ;;  %v195_v51 = vpack.c.bf16 %v179_v47, %v179_v47 }
  0xa0   :  { %215 = vst.msk [vmem:[%s448_s3 + $0x24] sm:$0xf] %vm205_vm1, %v198_v48 }
  0xa1   :  { %219 = vst.msk [vmem:[%s448_s3 + $0x34] sm:$0xf] %vm205_vm1, %v202_v49  ;;  %v158_v52 = vpop.f32.mrf.mxu2  ;;  %v168_v53 = vpop.f32.mrf.mxu3 }
  0xa2   :  { %208 = vst.msk [vmem:[%s448_s3 + $0x8] sm:$0xf] %vm205_vm1, %v191_v50  ;;  %v159_v54 = vadd.f32 %v363_v11, %v158_v52  ;;  %v169_v55 = vadd.f32 %v363_v11, %v168_v53  ;;  %v140_v56 = vpop.f32.mrf.mxu0  ;;  %v150_v57 = vpop.f32.mrf.mxu1 }
  0xa3   :  { %212 = vst.msk [vmem:[%s448_s3 + $0x18] sm:$0xf] %vm205_vm1, %v195_v51  ;;  %v141_v58 = vadd.f32 %v363_v11, %v140_v56  ;;  %v151_v59 = vadd.f32 %v363_v11, %v150_v57 }
  0xa4   :  { %v183_v60 = vmax.f32 %v159_v54, 0.0  ;;  %v187_v61 = vmax.f32 %v169_v55, 0.0 }
  0xa5   :  { %v176_v62 = vmax.f32 %v141_v58, 0.0  ;;  %v180_v63 = vmax.f32 %v151_v59, 0.0 }
  0xa6   :  { %v199_v0 = vpack.c.bf16 %v183_v60, %v183_v60  ;;  %v203_v1 = vpack.c.bf16 %v187_v61, %v187_v61 }
  0xa7   :  { %v192_v2 = vpack.c.bf16 %v176_v62, %v176_v62  ;;  %v196_v3 = vpack.c.bf16 %v180_v63, %v180_v63 }
  0xa8   :  { %216 = vst.msk [vmem:[%s448_s3 + $0x28] sm:$0xf] %vm205_vm1, %v199_v0 }
  0xa9   :  { %220 = vst.msk [vmem:[%s448_s3 + $0x38] sm:$0xf] %vm205_vm1, %v203_v1  ;;  %v160_v4 = vpop.f32.mrf.mxu2  ;;  %v170_v5 = vpop.f32.mrf.mxu3 }
  0xaa   :  { %209 = vst.msk [vmem:[%s448_s3 + $0xc] sm:$0xf] %vm205_vm1, %v192_v2  ;;  %v161_v6 = vadd.f32 %v363_v11, %v160_v4  ;;  %v171_v7 = vadd.f32 %v363_v11, %v170_v5 }
  0xab   :  { %213 = vst.msk [vmem:[%s448_s3 + $0x1c] sm:$0xf] %vm205_vm1, %v196_v3 }
  0xac   :  { %v184_v8 = vmax.f32 %v161_v6, 0.0  ;;  %v188_v9 = vmax.f32 %v171_v7, 0.0 }
  0xae   :  { %v200_v10 = vpack.c.bf16 %v184_v8, %v184_v8  ;;  %v204_v12 = vpack.c.bf16 %v188_v9, %v188_v9 }
  0xb0   :  { %217 = vst.msk [vmem:[%s448_s3 + $0x2c] sm:$0xf] %vm205_vm1, %v200_v10 }
  0xb1   :  { %221 = vst.msk [vmem:[%s448_s3 + $0x3c] sm:$0xf] %vm205_vm1, %v204_v12 }

// kernel: encoder_forward.4
= control target key start
LH: loop header
LB: loop body
LE: loop exit
PB: predicated region body
PF: predicated region fallthrough
CT: control target
= control target key end

     0   :  { %s1523_s1 = inlined_call_operand.vmem [shape: bf16[1024,128], index: 1, kind: input, shape index: {}]   ;;  %s1524_s0 = inlined_call_operand.vmem [shape: bf16[32,1024], index: 0, kind: input, shape index: {}]   ;;  %s1525_s2 = inlined_call_operand.vmem [shape: f32[1,128], index: 2, kind: input, shape index: {}]   ;;  %s1526_s3 = inlined_call_operand.vmem [shape: bf16[32,128], index: 3, kind: output, shape index: {}]  }
   0x1   :  { %v1137_v0 = vld [vmem:[%s1523_s1 + $0x38] sm:$0xff]  ;;  %v1136_v4 = vld [vmem:[%s1523_s1 + $0x30] sm:$0xff]  ;;  %v1135_v8 = vld [vmem:[%s1523_s1 + $0x28] sm:$0xff] }
   0x2   :  { %v1145_v1 = vld [vmem:[%s1523_s1 + $0x78] sm:$0xff]  ;;  %626 = vmatpush.bf16.msra.mxu0 %v1137_v0  ;;  %v1144_v5 = vld [vmem:[%s1523_s1 + $0x70] sm:$0xff]  ;;  %v1143_v9 = vld [vmem:[%s1523_s1 + $0x68] sm:$0xff] }
   0x3   :  { %v1153_v2 = vld [vmem:[%s1523_s1 + $0xb8] sm:$0xff]  ;;  %645 = vmatpush.bf16.msra.mxu1 %v1145_v1  ;;  %v1152_v6 = vld [vmem:[%s1523_s1 + $0xb0] sm:$0xff]  ;;  %v1151_v10 = vld [vmem:[%s1523_s1 + $0xa8] sm:$0xff] }
   0x4   :  { %v1161_v3 = vld [vmem:[%s1523_s1 + $0xf8] sm:$0xff]  ;;  %664 = vmatpush.bf16.msra.mxu2 %v1153_v2  ;;  %v1160_v7 = vld [vmem:[%s1523_s1 + $0xf0] sm:$0xff]  ;;  %v1159_v11 = vld [vmem:[%s1523_s1 + $0xe8] sm:$0xff] }
   0x5   :  { %683 = vmatpush.bf16.msra.mxu3 %v1161_v3  ;;  %v1134_v12 = vld [vmem:[%s1523_s1 + $0x20] sm:$0xff]  ;;  %v1133_v16 = vld [vmem:[%s1523_s1 + $0x18] sm:$0xff]  ;;  %v1132_v20 = vld [vmem:[%s1523_s1 + $0x10] sm:$0xff] }
   0x6   :  { %627 = vmatpush.bf16.msra.mxu0 %v1136_v4  ;;  %v1142_v13 = vld [vmem:[%s1523_s1 + $0x60] sm:$0xff]  ;;  %v1141_v17 = vld [vmem:[%s1523_s1 + $0x58] sm:$0xff]  ;;  %v1140_v21 = vld [vmem:[%s1523_s1 + $0x50] sm:$0xff] }
   0x7   :  { %646 = vmatpush.bf16.msra.mxu1 %v1144_v5  ;;  %v1150_v14 = vld [vmem:[%s1523_s1 + $0xa0] sm:$0xff]  ;;  %v1149_v18 = vld [vmem:[%s1523_s1 + $0x98] sm:$0xff]  ;;  %v1148_v22 = vld [vmem:[%s1523_s1 + $0x90] sm:$0xff] }
   0x8   :  { %665 = vmatpush.bf16.msra.mxu2 %v1152_v6  ;;  %v1158_v15 = vld [vmem:[%s1523_s1 + $0xe0] sm:$0xff]  ;;  %v1157_v19 = vld [vmem:[%s1523_s1 + $0xd8] sm:$0xff]  ;;  %v1156_v23 = vld [vmem:[%s1523_s1 + $0xd0] sm:$0xff] }
   0x9   :  { %684 = vmatpush.bf16.msra.mxu3 %v1160_v7  ;;  %v1131_v24 = vld [vmem:[%s1523_s1 + $0x8] sm:$0xff]  ;;  %v1130_v28 = vld [vmem:[%s1523_s1] sm:$0xff]  ;;  %v1185_v40 = vld [vmem:[%s1523_s1 + $0x1b8] sm:$0xff] }
   0xa   :  { %628 = vmatpush.bf16.msra.mxu0 %v1135_v8  ;;  %v1139_v25 = vld [vmem:[%s1523_s1 + $0x48] sm:$0xff]  ;;  %v1138_v29 = vld [vmem:[%s1523_s1 + $0x40] sm:$0xff]  ;;  %v1169_v41 = vld [vmem:[%s1523_s1 + $0x138] sm:$0xff] }
   0xb   :  { %647 = vmatpush.bf16.msra.mxu1 %v1143_v9  ;;  %v1147_v26 = vld [vmem:[%s1523_s1 + $0x88] sm:$0xff]  ;;  %v1146_v30 = vld [vmem:[%s1523_s1 + $0x80] sm:$0xff]  ;;  %v1177_v46 = vld [vmem:[%s1523_s1 + $0x178] sm:$0xff] }
   0xc   :  { %666 = vmatpush.bf16.msra.mxu2 %v1151_v10  ;;  %v1155_v27 = vld [vmem:[%s1523_s1 + $0xc8] sm:$0xff]  ;;  %v1154_v31 = vld [vmem:[%s1523_s1 + $0xc0] sm:$0xff]  ;;  %v1193_v47 = vld [vmem:[%s1523_s1 + $0x1f8] sm:$0xff] }
   0xd   :  { %685 = vmatpush.bf16.msra.mxu3 %v1159_v11  ;;  %v796_v32 = vld [vmem:[%s1524_s0] sm:$0xf]  ;;  %v1114_v34 = vld [vmem:[%s1524_s0 + $0x4] sm:$0xf]  ;;  %v804_v36 = vld [vmem:[%s1524_s0 + $0x8] sm:$0xf] }
   0xe   :  { %629 = vmatpush.bf16.msra.mxu0 %v1134_v12  ;;  %v1118_v33 = vld [vmem:[%s1524_s0 + $0x1c] sm:$0xf0]  ;;  %v798_v35 = vld [vmem:[%s1524_s0 + $0x20] sm:$0xf0]  ;;  %v1119_v37 = vld [vmem:[%s1524_s0 + $0x24] sm:$0xf0] }
   0xf   :  { %648 = vmatpush.bf16.msra.mxu1 %v1142_v13  ;;  %v1115_v38 = vld [vmem:[%s1524_s0 + $0xc] sm:$0xf]  ;;  %v797_v42 = vor.u32 %v1118_v33, %v796_v32  ;;  %v801_v43 = vor.u32 %v1114_v34, %v798_v35  ;;  %v805_v44 = vor.u32 %v1119_v37, %v804_v36  ;;  %v1184_v48 = vld [vmem:[%s1523_s1 + $0x1b0] sm:$0xff]  ;;  %v1182_v56 = vld [vmem:[%s1523_s1 + $0x1a0] sm:$0xff] }
  0x10   :  { %667 = vmatpush.bf16.msra.mxu2 %v1150_v14  ;;  %v806_v39 = vld [vmem:[%s1524_s0 + $0x28] sm:$0xf0]  ;;  %v1168_v49 = vld [vmem:[%s1523_s1 + $0x130] sm:$0xff]  ;;  %v1166_v57 = vld [vmem:[%s1523_s1 + $0x120] sm:$0xff] }
  0x11   :  { %686 = vmatpush.bf16.msra.mxu3 %v1158_v15  ;;  %v809_v45 = vor.u32 %v1115_v38, %v806_v39  ;;  %v1176_v50 = vld [vmem:[%s1523_s1 + $0x170] sm:$0xff]  ;;  %v1183_v52 = vld [vmem:[%s1523_s1 + $0x1a8] sm:$0xff]  ;;  %v1174_v58 = vld [vmem:[%s1523_s1 + $0x160] sm:$0xff] }
  0x12   :  { %630 = vmatpush.bf16.msra.mxu0 %v1133_v16  ;;  %v1192_v51 = vld [vmem:[%s1523_s1 + $0x1f0] sm:$0xff]  ;;  %v1167_v53 = vld [vmem:[%s1523_s1 + $0x128] sm:$0xff]  ;;  %v1190_v59 = vld [vmem:[%s1523_s1 + $0x1e0] sm:$0xff] }
  0x13   :  { %649 = vmatpush.bf16.msra.mxu1 %v1141_v17  ;;  %v1175_v54 = vld [vmem:[%s1523_s1 + $0x168] sm:$0xff]  ;;  %v828_v60 = vld [vmem:[%s1524_s0 + $0x40] sm:$0xf]  ;;  %v1122_v62 = vld [vmem:[%s1524_s0 + $0x44] sm:$0xf] }
  0x14   :  { %668 = vmatpush.bf16.msra.mxu2 %v1149_v18  ;;  %v1191_v55 = vld [vmem:[%s1523_s1 + $0x1e8] sm:$0xff]  ;;  %v1126_v61 = vld [vmem:[%s1524_s0 + $0x5c] sm:$0xf0]  ;;  %v830_v63 = vld [vmem:[%s1524_s0 + $0x60] sm:$0xf0] }
  0x15   :  { %687 = vmatpush.bf16.msra.mxu3 %v1157_v19  ;;  %v836_v0 = vld [vmem:[%s1524_s0 + $0x48] sm:$0xf]  ;;  %v1123_v2 = vld [vmem:[%s1524_s0 + $0x4c] sm:$0xf]  ;;  %v1181_v4 = vld [vmem:[%s1523_s1 + $0x198] sm:$0xff]  ;;  %v829_v6 = vor.u32 %v1126_v61, %v828_v60  ;;  %v833_v7 = vor.u32 %v1122_v62, %v830_v63 }
  0x16   :  { %631 = vmatpush.bf16.msra.mxu0 %v1132_v20  ;;  %v1127_v1 = vld [vmem:[%s1524_s0 + $0x64] sm:$0xf0]  ;;  %v838_v3 = vld [vmem:[%s1524_s0 + $0x68] sm:$0xf0]  ;;  %v1165_v5 = vld [vmem:[%s1523_s1 + $0x118] sm:$0xff] }
  0x17   :  { %650 = vmatpush.bf16.msra.mxu1 %v1140_v21  ;;  %v837_v8 = vor.u32 %v1127_v1, %v836_v0  ;;  %v841_v9 = vor.u32 %v1123_v2, %v838_v3  ;;  %v1173_v10 = vld [vmem:[%s1523_s1 + $0x158] sm:$0xff]  ;;  %v1180_v12 = vld [vmem:[%s1523_s1 + $0x190] sm:$0xff]  ;;  %v1179_v16 = vld [vmem:[%s1523_s1 + $0x188] sm:$0xff] }
  0x18   :  { %669 = vmatpush.bf16.msra.mxu2 %v1148_v22  ;;  %v1189_v11 = vld [vmem:[%s1523_s1 + $0x1d8] sm:$0xff]  ;;  %v1164_v13 = vld [vmem:[%s1523_s1 + $0x110] sm:$0xff]  ;;  %v1163_v17 = vld [vmem:[%s1523_s1 + $0x108] sm:$0xff] }
  0x19   :  { %688 = vmatpush.bf16.msra.mxu3 %v1156_v23  ;;  %v1172_v14 = vld [vmem:[%s1523_s1 + $0x150] sm:$0xff]  ;;  %v1171_v18 = vld [vmem:[%s1523_s1 + $0x148] sm:$0xff]  ;;  %v1178_v20 = vld [vmem:[%s1523_s1 + $0x180] sm:$0xff] }
  0x1a   :  { %632 = vmatpush.bf16.msra.mxu0 %v1131_v24  ;;  %v1188_v15 = vld [vmem:[%s1523_s1 + $0x1d0] sm:$0xff]  ;;  %v1187_v19 = vld [vmem:[%s1523_s1 + $0x1c8] sm:$0xff]  ;;  %v1162_v21 = vld [vmem:[%s1523_s1 + $0x100] sm:$0xff] }
  0x1b   :  { %651 = vmatpush.bf16.msra.mxu1 %v1139_v25  ;;  %v1170_v22 = vld [vmem:[%s1523_s1 + $0x140] sm:$0xff]  ;;  %v812_v24 = vld [vmem:[%s1524_s0 + $0x10] sm:$0xf]  ;;  %v1124_v38 = vld [vmem:[%s1524_s0 + $0x54] sm:$0xf] }
  0x1c   :  { %670 = vmatpush.bf16.msra.mxu2 %v1147_v26  ;;  %v1186_v23 = vld [vmem:[%s1523_s1 + $0x1c0] sm:$0xff]  ;;  %v1120_v25 = vld [vmem:[%s1524_s0 + $0x2c] sm:$0xf0]  ;;  %v1116_v26 = vld [vmem:[%s1524_s0 + $0x14] sm:$0xf] }
  0x1d   :  { %689 = vmatpush.bf16.msra.mxu3 %v1155_v27  ;;  %v814_v27 = vld [vmem:[%s1524_s0 + $0x30] sm:$0xf0]  ;;  %v813_v32 = vor.u32 %v1120_v25, %v812_v24  ;;  %v844_v36 = vld [vmem:[%s1524_s0 + $0x50] sm:$0xf] }
  0x1e   :  { %633 = vmatpush.bf16.msra.mxu0 %v1130_v28  ;;  %v820_v28 = vld [vmem:[%s1524_s0 + $0x18] sm:$0xf]  ;;  %v817_v33 = vor.u32 %v1116_v26, %v814_v27  ;;  %v1128_v37 = vld [vmem:[%s1524_s0 + $0x6c] sm:$0xf0]  ;;  %v846_v39 = vld [vmem:[%s1524_s0 + $0x70] sm:$0xf0] }
  0x1f   :  { %652 = vmatpush.bf16.msra.mxu1 %v1138_v29  ;;  %v1121_v29 = vld [vmem:[%s1524_s0 + $0x34] sm:$0xf0] }
  0x20   :  { %671 = vmatpush.bf16.msra.mxu2 %v1146_v30  ;;  %v1117_v30 = vld [vmem:[%s1524_s0 + $0x1c] sm:$0xf]  ;;  %v821_v34 = vor.u32 %v1121_v29, %v820_v28 }
  0x21   :  { %690 = vmatpush.bf16.msra.mxu3 %v1154_v31  ;;  %634 = vmatmul.bf16.vlgmr.msra.gmra.mxu0 %v797_v42  ;;  %v822_v31 = vld [vmem:[%s1524_s0 + $0x38] sm:$0xf0] }
  0x22   :  { %702 = vmatpush.bf16.msrb.mxu0 %v1169_v41  ;;  %653 = vmatmul.bf16.vlgmr.msra.gmra.mxu1 %v801_v43  ;;  %v825_v35 = vor.u32 %v1117_v30, %v822_v31  ;;  %v1129_v41 = vld [vmem:[%s1524_s0 + $0x74] sm:$0xf0]  ;;  %v1125_v42 = vld [vmem:[%s1524_s0 + $0x5c] sm:$0xf] }
  0x23   :  { %672 = vmatmul.bf16.vlgmr.msra.gmra.mxu2 %v805_v44  ;;  %721 = vmatpush.bf16.msrb.mxu1 %v1177_v46  ;;  %v854_v43 = vld [vmem:[%s1524_s0 + $0x78] sm:$0xf0]  ;;  %v845_v44 = vor.u32 %v1128_v37, %v844_v36 }
  0x24   :  { %740 = vmatpush.bf16.msrb.mxu2 %v1185_v40  ;;  %691 = vmatmul.bf16.vlgmr.msra.gmra.mxu3 %v809_v45  ;;  %v852_v40 = vld [vmem:[%s1524_s0 + $0x58] sm:$0xf]  ;;  %v849_v45 = vor.u32 %v1124_v38, %v846_v39 }
  0x25   :  { %759 = vmatpush.bf16.msrb.mxu3 %v1193_v47  ;;  %v853_v46 = vor.u32 %v1129_v41, %v852_v40  ;;  %v857_v47 = vor.u32 %v1125_v42, %v854_v43 }
  0x26   :  { %703 = vmatpush.bf16.msrb.mxu0 %v1168_v49 }
  0x27   :  { %722 = vmatpush.bf16.msrb.mxu1 %v1176_v50 }
  0x28   :  { %741 = vmatpush.bf16.msrb.mxu2 %v1184_v48 }
  0x29   :  { %760 = vmatpush.bf16.msrb.mxu3 %v1192_v51 }
  0x2a   :  { %704 = vmatpush.bf16.msrb.mxu0 %v1167_v53 }
  0x2b   :  { %723 = vmatpush.bf16.msrb.mxu1 %v1175_v54 }
  0x2c   :  { %742 = vmatpush.bf16.msrb.mxu2 %v1183_v52 }
  0x2d   :  { %761 = vmatpush.bf16.msrb.mxu3 %v1191_v55 }
  0x2e   :  { %705 = vmatpush.bf16.msrb.mxu0 %v1166_v57 }
  0x2f   :  { %724 = vmatpush.bf16.msrb.mxu1 %v1174_v58  ;;  %v1205_v58 = vld [vmem:[%s1525_s2] ss:$0 sm:$0xff] }
  0x30   :  { %743 = vmatpush.bf16.msrb.mxu2 %v1182_v56 }
  0x31   :  { %762 = vmatpush.bf16.msrb.mxu3 %v1190_v59  ;;  %639 = vmatmul.bf16.gmra.mxu0 %v829_v6 }
  0x32   :  { %706 = vmatpush.bf16.msrb.mxu0 %v1165_v5  ;;  %658 = vmatmul.bf16.gmra.mxu1 %v833_v7 }
  0x33   :  { %677 = vmatmul.bf16.gmra.mxu2 %v837_v8  ;;  %725 = vmatpush.bf16.msrb.mxu1 %v1173_v10 }
  0x34   :  { %744 = vmatpush.bf16.msrb.mxu2 %v1181_v4  ;;  %696 = vmatmul.bf16.gmra.mxu3 %v841_v9 }
  0x35   :  { %763 = vmatpush.bf16.msrb.mxu3 %v1189_v11 }
  0x36   :  { %707 = vmatpush.bf16.msrb.mxu0 %v1164_v13 }
  0x37   :  { %726 = vmatpush.bf16.msrb.mxu1 %v1172_v14 }
  0x38   :  { %745 = vmatpush.bf16.msrb.mxu2 %v1180_v12 }
  0x39   :  { %764 = vmatpush.bf16.msrb.mxu3 %v1188_v15 }
  0x3a   :  { %708 = vmatpush.bf16.msrb.mxu0 %v1163_v17 }
  0x3b   :  { %727 = vmatpush.bf16.msrb.mxu1 %v1171_v18 }
  0x3c   :  { %746 = vmatpush.bf16.msrb.mxu2 %v1179_v16 }
  0x3d   :  { %765 = vmatpush.bf16.msrb.mxu3 %v1187_v19 }
  0x3e   :  { %709 = vmatpush.bf16.msrb.mxu0 %v1162_v21 }
  0x3f   :  { %728 = vmatpush.bf16.msrb.mxu1 %v1170_v22 }
  0x40   :  { %747 = vmatpush.bf16.msrb.mxu2 %v1178_v20 }
  0x41   :  { %766 = vmatpush.bf16.msrb.mxu3 %v1186_v23  ;;  %710 = vmatmul.bf16.vlgmr.msrb.gmra.mxu0 %v813_v32 }
  0x42   :  { %729 = vmatmul.bf16.vlgmr.msrb.gmra.mxu1 %v817_v33 }
  0x43   :  { %748 = vmatmul.bf16.vlgmr.msrb.gmra.mxu2 %v821_v34 }
  0x44   :  { %767 = vmatmul.bf16.vlgmr.msrb.gmra.mxu3 %v825_v35 }
  0x51   :  { %715 = vmatmul.bf16.gmra.mxu0 %v845_v44 }
  0x52   :  { %734 = vmatmul.bf16.gmra.mxu1 %v849_v45 }
  0x53   :  { %753 = vmatmul.bf16.gmra.mxu2 %v853_v46 }
  0x54   :  { %772 = vmatmul.bf16.gmra.mxu3 %v857_v47 }
  0x9e   :  { %v635_v48 = vpop.f32.mrf.mxu0 }
  0x9f   :  { %v654_v49 = vpop.f32.mrf.mxu1  ;;  %v636_v61 = vadd.f32 %v1205_v58, %v635_v48 }
  0xa1   :  { %v655_v0 = vadd.f32 %v654_v49, %v636_v61 }
  0xa6   :  { %v673_v50 = vpop.f32.mrf.mxu2  ;;  %v637_v52 = vpop.f32.mrf.mxu0 }
  0xa7   :  { %v692_v51 = vpop.f32.mrf.mxu3  ;;  %v656_v53 = vpop.f32.mrf.mxu1  ;;  %v638_v1 = vadd.f32 %v1205_v58, %v637_v52  ;;  %v674_v4 = vadd.f32 %v673_v50, %v655_v0 }
  0xa9   :  { %v657_v7 = vadd.f32 %v656_v53, %v638_v1  ;;  %v693_v8 = vadd.f32 %v692_v51, %v674_v4 }
  0xae   :  { %v675_v54 = vpop.f32.mrf.mxu2  ;;  %v640_v56 = vpop.f32.mrf.mxu0 }
  0xaf   :  { %v694_v55 = vpop.f32.mrf.mxu3  ;;  %v659_v57 = vpop.f32.mrf.mxu1  ;;  %v676_v9 = vadd.f32 %v675_v54, %v657_v7  ;;  %v641_v13 = vadd.f32 %v1205_v58, %v640_v56 }
  0xb1   :  { %v695_v12 = vadd.f32 %v694_v55, %v676_v9  ;;  %v660_v19 = vadd.f32 %v659_v57, %v641_v13 }
  0xb6   :  { %v678_v59 = vpop.f32.mrf.mxu2  ;;  %v642_v62 = vpop.f32.mrf.mxu0 }
  0xb7   :  { %v697_v60 = vpop.f32.mrf.mxu3  ;;  %v661_v63 = vpop.f32.mrf.mxu1  ;;  %v643_v21 = vadd.f32 %v1205_v58, %v642_v62  ;;  %v679_v24 = vadd.f32 %v678_v59, %v660_v19 }
  0xb9   :  { %v662_v29 = vadd.f32 %v661_v63, %v643_v21  ;;  %v698_v32 = vadd.f32 %v697_v60, %v679_v24 }
  0xbe   :  { %v680_v2 = vpop.f32.mrf.mxu2  ;;  %v711_v5 = vpop.f32.mrf.mxu0 }
  0xbf   :  { %v699_v3 = vpop.f32.mrf.mxu3  ;;  %v730_v6 = vpop.f32.mrf.mxu1  ;;  %v712_v10 = vadd.f32 %v711_v5, %v693_v8  ;;  %v681_v33 = vadd.f32 %v680_v2, %v662_v29 }
  0xc1   :  { %v731_v17 = vadd.f32 %v730_v6, %v712_v10  ;;  %v700_v39 = vadd.f32 %v699_v3, %v681_v33 }
  0xc6   :  { %v749_v11 = vpop.f32.mrf.mxu2  ;;  %v713_v15 = vpop.f32.mrf.mxu0 }
  0xc7   :  { %v768_v14 = vpop.f32.mrf.mxu3  ;;  %v732_v16 = vpop.f32.mrf.mxu1  ;;  %v714_v18 = vadd.f32 %v713_v15, %v695_v12  ;;  %v750_v20 = vadd.f32 %v749_v11, %v731_v17 }
  0xc9   :  { %v733_v22 = vadd.f32 %v732_v16, %v714_v18  ;;  %v769_v25 = vadd.f32 %v768_v14, %v750_v20 }
  0xcb   :  { %v778_v34 = vmax.f32 %v769_v25, 0.0 }
  0xce   :  { %v751_v23 = vpop.f32.mrf.mxu2  ;;  %v716_v28 = vpop.f32.mrf.mxu0 }
  0xcf   :  { %v752_v26 = vadd.f32 %v751_v23, %v733_v22  ;;  %v770_v27 = vpop.f32.mrf.mxu3  ;;  %v735_v31 = vpop.f32.mrf.mxu1  ;;  %v717_v37 = vadd.f32 %v716_v28, %v698_v32 }
  0xd1   :  { %v771_v30 = vadd.f32 %v770_v27, %v752_v26  ;;  %v736_v42 = vadd.f32 %v735_v31, %v717_v37 }
  0xd3   :  { %v779_v35 = vmax.f32 %v771_v30, 0.0 }
  0xd5   :  { %v1197_v36 = vpack.c.bf16 %v779_v35, %v778_v34 }
  0xd6   :  { %v754_v38 = vpop.f32.mrf.mxu2  ;;  %v718_v41 = vpop.f32.mrf.mxu0 }
  0xd7   :  { %1198 = vst [vmem:[%s1526_s3] sm:$0xff] %v1197_v36   ;;  %v773_v40 = vpop.f32.mrf.mxu3  ;;  %v719_v43 = vadd.f32 %v718_v41, %v700_v39  ;;  %v755_v44 = vadd.f32 %v754_v38, %v736_v42  ;;  %v737_v45 = vpop.f32.mrf.mxu1 }
  0xd9   :  { %v738_v46 = vadd.f32 %v737_v45, %v719_v43  ;;  %v774_v48 = vadd.f32 %v773_v40, %v755_v44 }
  0xdb   :  { %v780_v52 = vmax.f32 %v774_v48, 0.0 }
  0xde   :  { %v756_v47 = vpop.f32.mrf.mxu2 }
  0xdf   :  { %v757_v49 = vadd.f32 %v756_v47, %v738_v46  ;;  %v775_v50 = vpop.f32.mrf.mxu3 }
  0xe1   :  { %v776_v51 = vadd.f32 %v775_v50, %v757_v49 }
  0xe3   :  { %v781_v53 = vmax.f32 %v776_v51, 0.0 }
  0xe5   :  { %v1202_v54 = vpack.c.bf16 %v781_v53, %v780_v52 }
  0xe7   :  { %1204 = vst [vmem:[%s1526_s3 + $0x8] sm:$0xff] %v1202_v54  }

// kernel: encoder_forward.5
= control target key start
LH: loop header
LB: loop body
LE: loop exit
PB: predicated region body
PF: predicated region fallthrough
CT: control target
= control target key end

     0   :  { %s2098_s1 = inlined_call_operand.vmem [shape: bf16[1152,128], index: 1, kind: input, shape index: {}]   ;;  %s2099_s0 = inlined_call_operand.vmem [shape: bf16[32,1152], index: 0, kind: input, shape index: {}]   ;;  %s2100_s2 = inlined_call_operand.vmem [shape: f32[1,128], index: 2, kind: input, shape index: {}]   ;;  %s2101_s3 = inlined_call_operand.vmem [shape: bf16[128,256], index: 3, kind: input, shape index: {}]   ;;  %s2102_s4 = inlined_call_operand.vmem [shape: f32[1,256], index: 4, kind: input, shape index: {}]   ;;  %s2103_s5 = inlined_call_operand.vmem [shape: f32[32,256], index: 5, kind: output, shape index: {}]  }
   0x1   :  { %v1486_v0 = vld [vmem:[%s2098_s1 + $0x38] sm:$0xff]  ;;  %v1485_v4 = vld [vmem:[%s2098_s1 + $0x30] sm:$0xff]  ;;  %v1484_v8 = vld [vmem:[%s2098_s1 + $0x28] sm:$0xff] }
   0x2   :  { %v1502_v1 = vld [vmem:[%s2098_s1 + $0xb8] sm:$0xff]  ;;  %712 = vmatpush.bf16.msra.mxu0 %v1486_v0  ;;  %v1501_v5 = vld [vmem:[%s2098_s1 + $0xb0] sm:$0xff]  ;;  %v1500_v9 = vld [vmem:[%s2098_s1 + $0xa8] sm:$0xff] }
   0x3   :  { %v1510_v2 = vld [vmem:[%s2098_s1 + $0xf8] sm:$0xff]  ;;  %750 = vmatpush.bf16.msra.mxu2 %v1502_v1  ;;  %v1509_v6 = vld [vmem:[%s2098_s1 + $0xf0] sm:$0xff]  ;;  %v1508_v10 = vld [vmem:[%s2098_s1 + $0xe8] sm:$0xff] }
   0x4   :  { %v1494_v3 = vld [vmem:[%s2098_s1 + $0x78] sm:$0xff]  ;;  %769 = vmatpush.bf16.msra.mxu3 %v1510_v2  ;;  %v1493_v7 = vld [vmem:[%s2098_s1 + $0x70] sm:$0xff]  ;;  %v1492_v11 = vld [vmem:[%s2098_s1 + $0x68] sm:$0xff] }
   0x5   :  { %731 = vmatpush.bf16.msra.mxu1 %v1494_v3  ;;  %v1483_v12 = vld [vmem:[%s2098_s1 + $0x20] sm:$0xff]  ;;  %v1482_v16 = vld [vmem:[%s2098_s1 + $0x18] sm:$0xff]  ;;  %v1481_v20 = vld [vmem:[%s2098_s1 + $0x10] sm:$0xff] }
   0x6   :  { %713 = vmatpush.bf16.msra.mxu0 %v1485_v4  ;;  %v1499_v13 = vld [vmem:[%s2098_s1 + $0xa0] sm:$0xff]  ;;  %v1498_v17 = vld [vmem:[%s2098_s1 + $0x98] sm:$0xff]  ;;  %v1497_v21 = vld [vmem:[%s2098_s1 + $0x90] sm:$0xff] }
   0x7   :  { %751 = vmatpush.bf16.msra.mxu2 %v1501_v5  ;;  %v1507_v14 = vld [vmem:[%s2098_s1 + $0xe0] sm:$0xff]  ;;  %v1506_v18 = vld [vmem:[%s2098_s1 + $0xd8] sm:$0xff]  ;;  %v1505_v22 = vld [vmem:[%s2098_s1 + $0xd0] sm:$0xff] }
   0x8   :  { %770 = vmatpush.bf16.msra.mxu3 %v1509_v6  ;;  %v1491_v15 = vld [vmem:[%s2098_s1 + $0x60] sm:$0xff]  ;;  %v1490_v19 = vld [vmem:[%s2098_s1 + $0x58] sm:$0xff]  ;;  %v1489_v23 = vld [vmem:[%s2098_s1 + $0x50] sm:$0xff] }
   0x9   :  { %732 = vmatpush.bf16.msra.mxu1 %v1493_v7  ;;  %v1480_v24 = vld [vmem:[%s2098_s1 + $0x8] sm:$0xff]  ;;  %v1479_v28 = vld [vmem:[%s2098_s1] sm:$0xff]  ;;  %v1049_v37 = vld [vmem:[%s2099_s0 + $0x2c] sm:$0xf0] }
   0xa   :  { %714 = vmatpush.bf16.msra.mxu0 %v1484_v8  ;;  %v1496_v25 = vld [vmem:[%s2098_s1 + $0x88] sm:$0xff]  ;;  %v1495_v29 = vld [vmem:[%s2098_s1 + $0x80] sm:$0xff]  ;;  %v1518_v40 = vld [vmem:[%s2098_s1 + $0x138] sm:$0xff] }
   0xb   :  { %752 = vmatpush.bf16.msra.mxu2 %v1500_v9  ;;  %v1504_v26 = vld [vmem:[%s2098_s1 + $0xc8] sm:$0xff]  ;;  %v1503_v30 = vld [vmem:[%s2098_s1 + $0xc0] sm:$0xff]  ;;  %v1534_v41 = vld [vmem:[%s2098_s1 + $0x1b8] sm:$0xff] }
   0xc   :  { %771 = vmatpush.bf16.msra.mxu3 %v1508_v10  ;;  %v1488_v27 = vld [vmem:[%s2098_s1 + $0x48] sm:$0xff]  ;;  %v1487_v31 = vld [vmem:[%s2098_s1 + $0x40] sm:$0xff]  ;;  %v1542_v46 = vld [vmem:[%s2098_s1 + $0x1f8] sm:$0xff] }
   0xd   :  { %733 = vmatpush.bf16.msra.mxu1 %v1492_v11  ;;  %v1039_v32 = vld [vmem:[%s2099_s0] sm:$0xf]  ;;  %v1465_v33 = vld [vmem:[%s2099_s0 + $0x20] sm:$0xf0]  ;;  %v1047_v34 = vld [vmem:[%s2099_s0 + $0x8] sm:$0xf] }
   0xe   :  { %715 = vmatpush.bf16.msra.mxu0 %v1483_v12  ;;  %v1466_v35 = vld [vmem:[%s2099_s0 + $0x28] sm:$0xf0]  ;;  %v1461_v38 = vld [vmem:[%s2099_s0 + $0x4] sm:$0xf]  ;;  %v1041_v39 = vld [vmem:[%s2099_s0 + $0x24] sm:$0xf0]  ;;  %v1040_v42 = vor.u32 %v1465_v33, %v1039_v32 }
   0xf   :  { %753 = vmatpush.bf16.msra.mxu2 %v1499_v13  ;;  %v1462_v36 = vld [vmem:[%s2099_s0 + $0xc] sm:$0xf]  ;;  %v1048_v43 = vor.u32 %v1466_v35, %v1047_v34  ;;  %v1044_v45 = vor.u32 %v1461_v38, %v1041_v39  ;;  %v1526_v47 = vld [vmem:[%s2098_s1 + $0x178] sm:$0xff]  ;;  %v1517_v48 = vld [vmem:[%s2098_s1 + $0x130] sm:$0xff] }
  0x10   :  { %772 = vmatpush.bf16.msra.mxu3 %v1507_v14  ;;  %v1052_v44 = vor.u32 %v1462_v36, %v1049_v37  ;;  %v1533_v49 = vld [vmem:[%s2098_s1 + $0x1b0] sm:$0xff]  ;;  %v1516_v52 = vld [vmem:[%s2098_s1 + $0x128] sm:$0xff]  ;;  %v1515_v56 = vld [vmem:[%s2098_s1 + $0x120] sm:$0xff] }
  0x11   :  { %734 = vmatpush.bf16.msra.mxu1 %v1491_v15  ;;  %v1541_v50 = vld [vmem:[%s2098_s1 + $0x1f0] sm:$0xff]  ;;  %v1532_v53 = vld [vmem:[%s2098_s1 + $0x1a8] sm:$0xff]  ;;  %v1531_v57 = vld [vmem:[%s2098_s1 + $0x1a0] sm:$0xff] }
  0x12   :  { %716 = vmatpush.bf16.msra.mxu0 %v1482_v16  ;;  %v1525_v51 = vld [vmem:[%s2098_s1 + $0x170] sm:$0xff]  ;;  %v1540_v54 = vld [vmem:[%s2098_s1 + $0x1e8] sm:$0xff]  ;;  %v1539_v58 = vld [vmem:[%s2098_s1 + $0x1e0] sm:$0xff] }
  0x13   :  { %754 = vmatpush.bf16.msra.mxu2 %v1498_v17  ;;  %v1524_v55 = vld [vmem:[%s2098_s1 + $0x168] sm:$0xff]  ;;  %v1523_v59 = vld [vmem:[%s2098_s1 + $0x160] sm:$0xff]  ;;  %v1083_v62 = vld [vmem:[%s2099_s0 + $0x50] sm:$0xf] }
  0x14   :  { %773 = vmatpush.bf16.msra.mxu3 %v1506_v18  ;;  %v1075_v60 = vld [vmem:[%s2099_s0 + $0x48] sm:$0xf]  ;;  %v1474_v61 = vld [vmem:[%s2099_s0 + $0x68] sm:$0xf0]  ;;  %v1475_v63 = vld [vmem:[%s2099_s0 + $0x70] sm:$0xf0] }
  0x15   :  { %735 = vmatpush.bf16.msra.mxu1 %v1490_v19  ;;  %v1471_v0 = vld [vmem:[%s2099_s0 + $0x54] sm:$0xf]  ;;  %v1085_v1 = vld [vmem:[%s2099_s0 + $0x74] sm:$0xf0]  ;;  %v1470_v2 = vld [vmem:[%s2099_s0 + $0x4c] sm:$0xf]  ;;  %v1076_v6 = vor.u32 %v1474_v61, %v1075_v60  ;;  %v1084_v7 = vor.u32 %v1475_v63, %v1083_v62 }
  0x16   :  { %717 = vmatpush.bf16.msra.mxu0 %v1481_v20  ;;  %v1077_v3 = vld [vmem:[%s2099_s0 + $0x6c] sm:$0xf0]  ;;  %v1514_v4 = vld [vmem:[%s2098_s1 + $0x118] sm:$0xff]  ;;  %v1088_v8 = vor.u32 %v1471_v0, %v1085_v1  ;;  %v1512_v16 = vld [vmem:[%s2098_s1 + $0x108] sm:$0xff] }
  0x17   :  { %755 = vmatpush.bf16.msra.mxu2 %v1497_v21  ;;  %v1530_v5 = vld [vmem:[%s2098_s1 + $0x198] sm:$0xff]  ;;  %v1080_v9 = vor.u32 %v1470_v2, %v1077_v3  ;;  %v1513_v12 = vld [vmem:[%s2098_s1 + $0x110] sm:$0xff]  ;;  %v1528_v17 = vld [vmem:[%s2098_s1 + $0x188] sm:$0xff] }
  0x18   :  { %774 = vmatpush.bf16.msra.mxu3 %v1505_v22  ;;  %v1538_v10 = vld [vmem:[%s2098_s1 + $0x1d8] sm:$0xff]  ;;  %v1529_v13 = vld [vmem:[%s2098_s1 + $0x190] sm:$0xff]  ;;  %v1536_v18 = vld [vmem:[%s2098_s1 + $0x1c8] sm:$0xff] }
  0x19   :  { %736 = vmatpush.bf16.msra.mxu1 %v1489_v23  ;;  %v1522_v11 = vld [vmem:[%s2098_s1 + $0x158] sm:$0xff]  ;;  %v1537_v14 = vld [vmem:[%s2098_s1 + $0x1d0] sm:$0xff]  ;;  %v1520_v19 = vld [vmem:[%s2098_s1 + $0x148] sm:$0xff] }
  0x1a   :  { %718 = vmatpush.bf16.msra.mxu0 %v1480_v24  ;;  %v1521_v15 = vld [vmem:[%s2098_s1 + $0x150] sm:$0xff]  ;;  %v1511_v20 = vld [vmem:[%s2098_s1 + $0x100] sm:$0xff]  ;;  %v1057_v32 = vld [vmem:[%s2099_s0 + $0x34] sm:$0xf0] }
  0x1b   :  { %756 = vmatpush.bf16.msra.mxu2 %v1496_v25  ;;  %v1527_v21 = vld [vmem:[%s2098_s1 + $0x180] sm:$0xff]  ;;  %v1055_v24 = vld [vmem:[%s2099_s0 + $0x10] sm:$0xf]  ;;  %v1467_v25 = vld [vmem:[%s2099_s0 + $0x30] sm:$0xf0] }
  0x1c   :  { %775 = vmatpush.bf16.msra.mxu3 %v1504_v26  ;;  %v1535_v22 = vld [vmem:[%s2098_s1 + $0x1c0] sm:$0xff]  ;;  %v1550_v26 = vld [vmem:[%s2098_s1 + $0x238] sm:$0xff]  ;;  %v1056_v33 = vor.u32 %v1467_v25, %v1055_v24  ;;  %v1549_v37 = vld [vmem:[%s2098_s1 + $0x230] sm:$0xff] }
  0x1d   :  { %737 = vmatpush.bf16.msra.mxu1 %v1488_v27  ;;  %v1519_v23 = vld [vmem:[%s2098_s1 + $0x140] sm:$0xff]  ;;  %v1063_v27 = vld [vmem:[%s2099_s0 + $0x18] sm:$0xf]  ;;  %v1548_v38 = vld [vmem:[%s2098_s1 + $0x228] sm:$0xff] }
  0x1e   :  { %719 = vmatpush.bf16.msra.mxu0 %v1479_v28  ;;  %v1468_v28 = vld [vmem:[%s2099_s0 + $0x38] sm:$0xf0]  ;;  %v1547_v39 = vld [vmem:[%s2098_s1 + $0x220] sm:$0xff]  ;;  %v1565_v3 = vld [vmem:[%s2101_s3 + $0x74] sm:$0xf] }
  0x1f   :  { %757 = vmatpush.bf16.msra.mxu2 %v1495_v29  ;;  %v1464_v29 = vld [vmem:[%s2099_s0 + $0x1c] sm:$0xf]  ;;  %v1064_v34 = vor.u32 %v1468_v28, %v1063_v27  ;;  %v1559_v27 = vld [vmem:[%s2101_s3 + $0x44] sm:$0xf]  ;;  %v1433_v28 = vld [vmem:[%s2101_s3 + $0x48] sm:$0xf0] }
  0x20   :  { %776 = vmatpush.bf16.msra.mxu3 %v1503_v30  ;;  %v1065_v30 = vld [vmem:[%s2099_s0 + $0x3c] sm:$0xf0] }
  0x21   :  { %738 = vmatpush.bf16.msra.mxu1 %v1487_v31  ;;  %720 = vmatmul.bf16.vlgmr.msra.gmra.mxu0 %v1040_v42  ;;  %v1463_v31 = vld [vmem:[%s2099_s0 + $0x14] sm:$0xf]  ;;  %v1068_v35 = vor.u32 %v1464_v29, %v1065_v30  ;;  %v1099_v42 = vld [vmem:[%s2099_s0 + $0x60] sm:$0xf]  ;;  %v1436_v30 = vor.u32 %v1559_v27, %v1433_v28 }
  0x22   :  { %788 = vmatpush.bf16.msrb.mxu0 %v1518_v40  ;;  %758 = vmatmul.bf16.vlgmr.msra.gmra.mxu2 %v1048_v43  ;;  %v1060_v36 = vor.u32 %v1463_v31, %v1057_v32  ;;  %v1091_v40 = vld [vmem:[%s2099_s0 + $0x58] sm:$0xf]  ;;  %v1477_v43 = vld [vmem:[%s2099_s0 + $0x80] sm:$0xf0]  ;;  %v1431_v29 = vld [vmem:[%s2101_s3 + $0x40] sm:$0xf] }
  0x23   :  { %826 = vmatpush.bf16.msrb.mxu2 %v1534_v41  ;;  %777 = vmatmul.bf16.vlgmr.msra.gmra.mxu3 %v1052_v44  ;;  %v1476_v41 = vld [vmem:[%s2099_s0 + $0x78] sm:$0xf0]  ;;  %v1473_v44 = vld [vmem:[%s2099_s0 + $0x64] sm:$0xf]  ;;  %v1560_v31 = vld [vmem:[%s2101_s3 + $0x44] sm:$0xf0] }
  0x24   :  { %739 = vmatmul.bf16.vlgmr.msra.gmra.mxu1 %v1044_v45  ;;  %845 = vmatpush.bf16.msrb.mxu3 %v1542_v46  ;;  %v1101_v45 = vld [vmem:[%s2099_s0 + $0x84] sm:$0xf0]  ;;  %v1546_v46 = vld [vmem:[%s2098_s1 + $0x218] sm:$0xff] }
  0x25   :  { %807 = vmatpush.bf16.msrb.mxu1 %v1526_v47  ;;  %v1472_v47 = vld [vmem:[%s2099_s0 + $0x5c] sm:$0xf] }
  0x26   :  { %789 = vmatpush.bf16.msrb.mxu0 %v1517_v48  ;;  %v1093_v48 = vld [vmem:[%s2099_s0 + $0x7c] sm:$0xf0] }
  0x27   :  { %827 = vmatpush.bf16.msrb.mxu2 %v1533_v49  ;;  %v1092_v49 = vor.u32 %v1476_v41, %v1091_v40 }
  0x28   :  { %846 = vmatpush.bf16.msrb.mxu3 %v1541_v50  ;;  %v1100_v50 = vor.u32 %v1477_v43, %v1099_v42  ;;  %v1555_v43 = vld [vmem:[%s2101_s3 + $0x24] sm:$0xf] }
  0x29   :  { %808 = vmatpush.bf16.msrb.mxu1 %v1525_v51  ;;  %v1104_v51 = vor.u32 %v1473_v44, %v1101_v45  ;;  %v1417_v44 = vld [vmem:[%s2101_s3 + $0x28] sm:$0xf0]  ;;  %v1415_v45 = vld [vmem:[%s2101_s3 + $0x20] sm:$0xf] }
  0x2a   :  { %790 = vmatpush.bf16.msrb.mxu0 %v1516_v52  ;;  %v1096_v52 = vor.u32 %v1472_v47, %v1093_v48  ;;  %v1556_v47 = vld [vmem:[%s2101_s3 + $0x24] sm:$0xf0]  ;;  %v1553_v48 = vld [vmem:[%s2101_s3 + $0x14] sm:$0xf] }
  0x2b   :  { %828 = vmatpush.bf16.msrb.mxu2 %v1532_v53  ;;  %v1545_v53 = vld [vmem:[%s2098_s1 + $0x210] sm:$0xff] }
  0x2c   :  { %847 = vmatpush.bf16.msrb.mxu3 %v1540_v54  ;;  %v1544_v54 = vld [vmem:[%s2098_s1 + $0x208] sm:$0xff] }
  0x2d   :  { %809 = vmatpush.bf16.msrb.mxu1 %v1524_v55  ;;  %v1543_v55 = vld [vmem:[%s2098_s1 + $0x200] sm:$0xff] }
  0x2e   :  { %791 = vmatpush.bf16.msrb.mxu0 %v1515_v56  ;;  %v1071_v56 = vld [vmem:[%s2099_s0 + $0x20] sm:$0xf] }
  0x2f   :  { %829 = vmatpush.bf16.msrb.mxu2 %v1531_v57  ;;  %v1469_v57 = vld [vmem:[%s2099_s0 + $0x40] sm:$0xf0] }
  0x30   :  { %848 = vmatpush.bf16.msrb.mxu3 %v1539_v58  ;;  %v1107_v58 = vld [vmem:[%s2099_s0 + $0x68] sm:$0xf]  ;;  %v1072_v60 = vor.u32 %v1469_v57, %v1071_v56 }
  0x31   :  { %810 = vmatpush.bf16.msrb.mxu1 %v1523_v59  ;;  %725 = vmatmul.bf16.gmra.mxu0 %v1076_v6  ;;  %v1478_v59 = vld [vmem:[%s2099_s0 + $0x88] sm:$0xf0]  ;;  %v1455_v6 = vld [vmem:[%s2101_s3 + $0x70] sm:$0xf] }
  0x32   :  { %792 = vmatpush.bf16.msrb.mxu0 %v1514_v4  ;;  %763 = vmatmul.bf16.gmra.mxu2 %v1084_v7  ;;  %v1108_v61 = vor.u32 %v1478_v59, %v1107_v58  ;;  %v1457_v4 = vld [vmem:[%s2101_s3 + $0x78] sm:$0xf0]  ;;  %v1566_v7 = vld [vmem:[%s2101_s3 + $0x74] sm:$0xf0]  ;;  %v1551_v59 = vld [vmem:[%s2101_s3 + $0x4] sm:$0xf] }
  0x33   :  { %830 = vmatpush.bf16.msrb.mxu2 %v1530_v5  ;;  %782 = vmatmul.bf16.gmra.mxu3 %v1088_v8  ;;  %v1460_v5 = vor.u32 %v1565_v3, %v1457_v4  ;;  %v1456_v8 = vor.u32 %v1566_v7, %v1455_v6  ;;  %v1552_v4 = vld [vmem:[%s2101_s3 + $0x4] sm:$0xf0]  ;;  %v1575_v6 = vld [vmem:[%s2100_s2] ss:$0 sm:$0xff] }
  0x34   :  { %744 = vmatmul.bf16.gmra.mxu1 %v1080_v9  ;;  %849 = vmatpush.bf16.msrb.mxu3 %v1538_v10 }
  0x35   :  { %811 = vmatpush.bf16.msrb.mxu1 %v1522_v11 }
  0x36   :  { %793 = vmatpush.bf16.msrb.mxu0 %v1513_v12  ;;  %v1563_v12 = vld [vmem:[%s2101_s3 + $0x64] sm:$0xf] }
  0x37   :  { %831 = vmatpush.bf16.msrb.mxu2 %v1529_v13  ;;  %v1449_v13 = vld [vmem:[%s2101_s3 + $0x68] sm:$0xf0] }
  0x38   :  { %850 = vmatpush.bf16.msrb.mxu3 %v1537_v14  ;;  %v1447_v14 = vld [vmem:[%s2101_s3 + $0x60] sm:$0xf] }
  0x39   :  { %812 = vmatpush.bf16.msrb.mxu1 %v1521_v15  ;;  %v1452_v15 = vor.u32 %v1563_v12, %v1449_v13 }
  0x3a   :  { %794 = vmatpush.bf16.msrb.mxu0 %v1512_v16  ;;  %v1564_v16 = vld [vmem:[%s2101_s3 + $0x64] sm:$0xf0] }
  0x3b   :  { %832 = vmatpush.bf16.msrb.mxu2 %v1528_v17 }
  0x3c   :  { %851 = vmatpush.bf16.msrb.mxu3 %v1536_v18  ;;  %v1448_v18 = vor.u32 %v1564_v16, %v1447_v14 }
  0x3d   :  { %813 = vmatpush.bf16.msrb.mxu1 %v1520_v19  ;;  %v1561_v19 = vld [vmem:[%s2101_s3 + $0x54] sm:$0xf] }
  0x3e   :  { %795 = vmatpush.bf16.msrb.mxu0 %v1511_v20  ;;  %v1441_v20 = vld [vmem:[%s2101_s3 + $0x58] sm:$0xf0] }
  0x3f   :  { %833 = vmatpush.bf16.msrb.mxu2 %v1527_v21  ;;  %v1444_v21 = vor.u32 %v1561_v19, %v1441_v20 }
  0x40   :  { %852 = vmatpush.bf16.msrb.mxu3 %v1535_v22  ;;  %v1439_v22 = vld [vmem:[%s2101_s3 + $0x50] sm:$0xf] }
  0x41   :  { %814 = vmatpush.bf16.msrb.mxu1 %v1519_v23  ;;  %796 = vmatmul.bf16.vlgmr.msrb.gmra.mxu0 %v1056_v33  ;;  %v1562_v23 = vld [vmem:[%s2101_s3 + $0x54] sm:$0xf0]  ;;  %v1432_v33 = vor.u32 %v1560_v31, %v1431_v29 }
  0x42   :  { %864 = vmatpush.bf16.msra.mxu0 %v1550_v26  ;;  %834 = vmatmul.bf16.vlgmr.msrb.gmra.mxu2 %v1064_v34  ;;  %v1440_v24 = vor.u32 %v1562_v23, %v1439_v22  ;;  %v1557_v34 = vld [vmem:[%s2101_s3 + $0x34] sm:$0xf] }
  0x43   :  { %853 = vmatmul.bf16.vlgmr.msrb.gmra.mxu3 %v1068_v35  ;;  %1006 = vmatpush.bf16.msra.mxu2 %v1460_v5  ;;  %v1425_v35 = vld [vmem:[%s2101_s3 + $0x38] sm:$0xf0] }
  0x44   :  { %1567 = vmatpush.bf16.msra.mxu3 %v1550_v26  ;;  %815 = vmatmul.bf16.vlgmr.msrb.gmra.mxu1 %v1060_v36 }
  0x45   :  { %987 = vmatpush.bf16.msra.mxu1 %v1456_v8 }
  0x46   :  { %865 = vmatpush.bf16.msra.mxu0 %v1549_v37 }
  0x47   :  { %1007 = vmatpush.bf16.msra.mxu2 %v1452_v15 }
  0x48   :  { %1568 = vmatpush.bf16.msra.mxu3 %v1549_v37  ;;  %v1428_v37 = vor.u32 %v1557_v34, %v1425_v35 }
  0x49   :  { %988 = vmatpush.bf16.msra.mxu1 %v1448_v18 }
  0x4a   :  { %866 = vmatpush.bf16.msra.mxu0 %v1548_v38 }
  0x4b   :  { %1008 = vmatpush.bf16.msra.mxu2 %v1444_v21 }
  0x4c   :  { %1569 = vmatpush.bf16.msra.mxu3 %v1548_v38  ;;  %v1423_v38 = vld [vmem:[%s2101_s3 + $0x30] sm:$0xf] }
  0x4d   :  { %989 = vmatpush.bf16.msra.mxu1 %v1440_v24 }
  0x4e   :  { %867 = vmatpush.bf16.msra.mxu0 %v1547_v39 }
  0x4f   :  { %1009 = vmatpush.bf16.msra.mxu2 %v1436_v30 }
  0x50   :  { %1570 = vmatpush.bf16.msra.mxu3 %v1547_v39  ;;  %v1558_v39 = vld [vmem:[%s2101_s3 + $0x34] sm:$0xf0] }
  0x51   :  { %801 = vmatmul.bf16.gmra.mxu0 %v1092_v49  ;;  %990 = vmatpush.bf16.msra.mxu1 %v1432_v33  ;;  %v1424_v40 = vor.u32 %v1558_v39, %v1423_v38  ;;  %v1409_v49 = vld [vmem:[%s2101_s3 + $0x18] sm:$0xf0] }
  0x52   :  { %868 = vmatpush.bf16.msra.mxu0 %v1546_v46  ;;  %839 = vmatmul.bf16.gmra.mxu2 %v1100_v50  ;;  %v1416_v50 = vor.u32 %v1556_v47, %v1415_v45 }
  0x53   :  { %858 = vmatmul.bf16.gmra.mxu3 %v1104_v51  ;;  %1010 = vmatpush.bf16.msra.mxu2 %v1428_v37  ;;  %v1412_v51 = vor.u32 %v1553_v48, %v1409_v49 }
  0x54   :  { %1571 = vmatpush.bf16.msra.mxu3 %v1546_v46  ;;  %820 = vmatmul.bf16.gmra.mxu1 %v1096_v52  ;;  %v1420_v46 = vor.u32 %v1555_v43, %v1417_v44 }
  0x55   :  { %991 = vmatpush.bf16.msra.mxu1 %v1424_v40 }
  0x56   :  { %869 = vmatpush.bf16.msra.mxu0 %v1545_v53 }
  0x57   :  { %1011 = vmatpush.bf16.msra.mxu2 %v1420_v46 }
  0x58   :  { %1572 = vmatpush.bf16.msra.mxu3 %v1545_v53  ;;  %v1407_v53 = vld [vmem:[%s2101_s3 + $0x10] sm:$0xf] }
  0x59   :  { %992 = vmatpush.bf16.msra.mxu1 %v1416_v50 }
  0x5a   :  { %870 = vmatpush.bf16.msra.mxu0 %v1544_v54 }
  0x5b   :  { %1012 = vmatpush.bf16.msra.mxu2 %v1412_v51 }
  0x5c   :  { %1573 = vmatpush.bf16.msra.mxu3 %v1544_v54  ;;  %v1554_v54 = vld [vmem:[%s2101_s3 + $0x14] sm:$0xf0] }
  0x5e   :  { %871 = vmatpush.bf16.msra.mxu0 %v1543_v55 }
  0x60   :  { %1574 = vmatpush.bf16.msra.mxu3 %v1543_v55  ;;  %v1408_v55 = vor.u32 %v1554_v54, %v1407_v53 }
  0x61   :  { %872 = vmatmul.bf16.vlgmr.msra.gmra.mxu0 %v1072_v60  ;;  %v1401_v60 = vld [vmem:[%s2101_s3 + $0x8] sm:$0xf0] }
  0x62   :  { %993 = vmatpush.bf16.msra.mxu1 %v1408_v55  ;;  %v1404_v3 = vor.u32 %v1551_v59, %v1401_v60 }
  0x63   :  { %877 = vmatmul.bf16.vlgmr.msra.gmra.mxu3 %v1108_v61  ;;  %v1399_v61 = vld [vmem:[%s2101_s3] sm:$0xf] }
  0x64   :  { %v1400_v5 = vor.u32 %v1552_v4, %v1399_v61  ;;  %1013 = vmatpush.bf16.msra.mxu2 %v1404_v3 }
  0x66   :  { %994 = vmatpush.bf16.msra.mxu1 %v1400_v5 }
  0x9e   :  { %v1930_v62 = vpop.f32.mrf.mxu0 }
  0x9f   :  { %v722_v14 = vadd.f32 %v1575_v6, %v1930_v62 }
  0xa1   :  { %v1932_v63 = vpop.f32.mrf.mxu1 }
  0xa2   :  { %v741_v16 = vadd.f32 %v1932_v63, %v722_v14 }
  0xa5   :  { %v1936_v1 = vpop.f32.mrf.mxu2 }
  0xa6   :  { %v1934_v0 = vpop.f32.mrf.mxu3  ;;  %v1938_v2 = vpop.f32.mrf.mxu0  ;;  %v760_v19 = vadd.f32 %v1936_v1, %v741_v16 }
  0xa7   :  { %v724_v15 = vadd.f32 %v1575_v6, %v1938_v2 }
  0xa8   :  { %v779_v27 = vadd.f32 %v1934_v0, %v760_v19 }
  0xa9   :  { %v1954_v10 = vpop.f32.mrf.mxu1 }
  0xaa   :  { %v743_v18 = vadd.f32 %v1954_v10, %v724_v15 }
  0xad   :  { %v1970_v17 = vpop.f32.mrf.mxu2 }
  0xae   :  { %v1952_v9 = vpop.f32.mrf.mxu3  ;;  %v1956_v11 = vpop.f32.mrf.mxu0  ;;  %v762_v20 = vadd.f32 %v1970_v17, %v743_v18 }
  0xaf   :  { %v727_v10 = vadd.f32 %v1575_v6, %v1956_v11 }
  0xb0   :  { %v781_v28 = vadd.f32 %v1952_v9, %v762_v20 }
  0xb1   :  { %v2000_v32 = vpop.f32.mrf.mxu1 }
  0xb2   :  { %v746_v38 = vadd.f32 %v2000_v32, %v727_v10 }
  0xb5   :  { %v2008_v36 = vpop.f32.mrf.mxu2 }
  0xb6   :  { %v1984_v25 = vpop.f32.mrf.mxu3  ;;  %v1986_v26 = vpop.f32.mrf.mxu0  ;;  %v765_v9 = vadd.f32 %v2008_v36, %v746_v38 }
  0xb7   :  { %v729_v2 = vadd.f32 %v1575_v6, %v1986_v26 }
  0xb8   :  { %v784_v45 = vadd.f32 %v1984_v25, %v765_v9  ;;  %v901_v25 = vld [vmem:[%s2102_s4] sm:$0x3] }
  0xb9   :  { %v747_v52 = vpop.f32.mrf.mxu1  ;;  %v904_v61 = vperm.slane %v901_v25, 1 }
  0xba   :  { %v748_v17 = vadd.f32 %v747_v52, %v729_v2 }
  0xbd   :  { %v766_v56 = vpop.f32.mrf.mxu2 }
  0xbe   :  { %v2016_v41 = vpop.f32.mrf.mxu3  ;;  %v797_v42 = vpop.f32.mrf.mxu0  ;;  %v767_v0 = vadd.f32 %v766_v56, %v748_v17 }
  0xbf   :  { %v798_v29 = vadd.f32 %v797_v42, %v779_v27 }
  0xc0   :  { %v786_v26 = vadd.f32 %v2016_v41, %v767_v0 }
  0xc1   :  { %v816_v7 = vpop.f32.mrf.mxu1 }
  0xc2   :  { %v817_v31 = vadd.f32 %v816_v7, %v798_v29 }
  0xc5   :  { %v835_v12 = vpop.f32.mrf.mxu2 }
  0xc6   :  { %v854_v57 = vpop.f32.mrf.mxu3  ;;  %v799_v58 = vpop.f32.mrf.mxu0  ;;  %v836_v34 = vadd.f32 %v835_v12, %v817_v31 }
  0xc7   :  { %v800_v62 = vadd.f32 %v799_v58, %v781_v28  ;;  %v903_v58 = vperm.slane %v901_v25, 0 }
  0xc8   :  { %v855_v39 = vadd.f32 %v854_v57, %v836_v34 }
  0xc9   :  { %v818_v22 = vpop.f32.mrf.mxu1 }
  0xca   :  { %v819_v1 = vadd.f32 %v818_v22, %v800_v62 }
  0xcd   :  { %v837_v24 = vpop.f32.mrf.mxu2 }
  0xce   :  { %v856_v8 = vpop.f32.mrf.mxu3  ;;  %v802_v13 = vpop.f32.mrf.mxu0  ;;  %v838_v35 = vadd.f32 %v837_v24, %v819_v1 }
  0xcf   :  { %v803_v49 = vadd.f32 %v802_v13, %v784_v45 }
  0xd0   :  { %v857_v40 = vadd.f32 %v856_v8, %v838_v35 }
  0xd1   :  { %v821_v33 = vpop.f32.mrf.mxu1 }
  0xd2   :  { %v822_v51 = vadd.f32 %v821_v33, %v803_v49 }
  0xd5   :  { %v840_v37 = vpop.f32.mrf.mxu2 }
  0xd6   :  { %v859_v21 = vpop.f32.mrf.mxu3  ;;  %v804_v23 = vpop.f32.mrf.mxu0  ;;  %v841_v52 = vadd.f32 %v840_v37, %v822_v51 }
  0xd7   :  { %v805_v46 = vadd.f32 %v804_v23, %v786_v26 }
  0xd8   :  { %v860_v55 = vadd.f32 %v859_v21, %v841_v52 }
  0xd9   :  { %v823_v48 = vpop.f32.mrf.mxu1 }
  0xda   :  { %v824_v50 = vadd.f32 %v823_v48, %v805_v46 }
  0xdd   :  { %v842_v32 = vpop.f32.mrf.mxu2 }
  0xde   :  { %v861_v30 = vpop.f32.mrf.mxu3  ;;  %v873_v63 = vpop.f32.mrf.mxu0  ;;  %v843_v36 = vadd.f32 %v842_v32, %v824_v50 }
  0xdf   :  { %v874_v43 = vadd.f32 %v873_v63, %v855_v39 }
  0xe0   :  { %v862_v54 = vadd.f32 %v861_v30, %v843_v36 }
  0xe6   :  { %v875_v42 = vpop.f32.mrf.mxu0  ;;  %v878_v11 = vpop.f32.mrf.mxu3 }
  0xe7   :  { %v876_v44 = vadd.f32 %v875_v42, %v857_v40  ;;  %v879_v56 = vadd.f32 %v878_v11, %v860_v55 }
  0xe9   :  { %v883_v47 = vpack.c.bf16 %v876_v44, %v874_v43 }
  0xeb   :  { %995 = vmatmul.bf16.vlgmr.msra.gmra.mxu1 %v883_v47  ;;  %1014 = vmatmul.bf16.vlgmr.msra.gmra.mxu2 %v883_v47 }
  0xee   :  { %v880_v53 = vpop.f32.mrf.mxu3 }
  0xef   :  { %v881_v41 = vadd.f32 %v880_v53, %v862_v54 }
  0xf1   :  { %v884_v57 = vpack.c.bf16 %v881_v41, %v879_v56 }
  0xfb   :  { %1000 = vmatmul.bf16.gmra.mxu1 %v884_v57  ;;  %1019 = vmatmul.bf16.gmra.mxu2 %v884_v57 }
 0x168   :  { %v996_v59 = vpop.f32.mrf.mxu1 }
 0x169   :  { %v997_v60 = vadd.f32 %v996_v59, %v903_v58 }
 0x16b   :  { %1025 = vst [vmem:[%s2103_s5] sm:$0xff] %v997_v60 }
 0x16e   :  { %v1015_v3 = vpop.f32.mrf.mxu2 }
 0x16f   :  { %v1016_v4 = vadd.f32 %v1015_v3, %v904_v61 }
 0x170   :  { %v998_v5 = vpop.f32.mrf.mxu1 }
 0x171   :  { %1026 = vst [vmem:[%s2103_s5 + $0x8] sm:$0xff] %v1016_v4  ;;  %v999_v6 = vadd.f32 %v998_v5, %v903_v58 }
 0x173   :  { %1027 = vst [vmem:[%s2103_s5 + $0x10] sm:$0xff] %v999_v6 }
 0x176   :  { %v1017_v7 = vpop.f32.mrf.mxu2 }
 0x177   :  { %v1018_v8 = vadd.f32 %v1017_v7, %v904_v61 }
 0x178   :  { %v1001_v12 = vpop.f32.mrf.mxu1 }
 0x179   :  { %1028 = vst [vmem:[%s2103_s5 + $0x18] sm:$0xff] %v1018_v8  ;;  %v1002_v13 = vadd.f32 %v1001_v12, %v903_v58 }
 0x17b   :  { %1029 = vst [vmem:[%s2103_s5 + $0x20] sm:$0xff] %v1002_v13 }
 0x17e   :  { %v1020_v14 = vpop.f32.mrf.mxu2 }
 0x17f   :  { %v1021_v15 = vadd.f32 %v1020_v14, %v904_v61 }
 0x180   :  { %v1003_v16 = vpop.f32.mrf.mxu1 }
 0x181   :  { %1030 = vst [vmem:[%s2103_s5 + $0x28] sm:$0xff] %v1021_v15  ;;  %v1004_v18 = vadd.f32 %v1003_v16, %v903_v58 }
 0x183   :  { %1031 = vst [vmem:[%s2103_s5 + $0x30] sm:$0xff] %v1004_v18 }
 0x186   :  { %v1022_v19 = vpop.f32.mrf.mxu2 }
 0x187   :  { %v1023_v20 = vadd.f32 %v1022_v19, %v904_v61 }
 0x189   :  { %1032 = vst [vmem:[%s2103_s5 + $0x38] sm:$0xff] %v1023_v20 }

</bundles_post_ra>
